<compile_context>
chip_gen: v7x
topology: tpu7x:2x2x1
jax: 0.10.0
libtpu: 0.0.40
codegen_flags: <defaults>
</compile_context>

<pallas_src>
import numpy as np
import jax
import jax.numpy as jnp
from jax.experimental import pallas as pl
from jax.experimental.pallas import tpu as pltpu

INPUT = 1
HIDDEN = 100
OUTPUT = 1
LANE = 128


def _pad_to(n, m):
    return ((n + m - 1) // m) * m


HP = _pad_to(HIDDEN, LANE)   # padded hidden size (128)
OP = _pad_to(OUTPUT, LANE)   # padded output size (128)

# Packed gate order: (i, f, o, g).  Raw PyTorch order is (i, f, g, o) -> source blocks 0,1,3,2.
GATE_SRC = (0, 1, 3, 2)


def lstm_kernel(x_ref, wih_ref, whh_ref, b_ref, wout_ref, bout_ref,
                out_ref, xw_scr):
    """Full LSTM recurrence + final linear projection, all in VMEM.

    x_ref   : (L, INPUT)   raw input sequence (not lane-padded)
    wih_ref : (INPUT, 4*HP) input->gates weights, transposed, gate-block padded,
                            (i,f,o,g) order, i/f/o columns pre-scaled by 0.5
    whh_ref : (HP, 4*HP)    hidden->gates weights, same packing/pre-scale
    b_ref   : (1, 4*HP)     combined bias (b_ih + b_hh), same packing/pre-scale
    wout_ref: (HP, OP)      final linear weight (transposed, padded)
    bout_ref: (1, OP)       final linear bias (padded)
    out_ref : (1, OP)       linear(h_last)  (padded)
    xw_scr  : (L, 4*HP)     precomputed input projection (+ bias), one row per timestep
    """
    Hp = whh_ref.shape[0]
    L = x_ref.shape[0]
    n_in = x_ref.shape[1]

    # --- one-time input projection on the VPU (INPUT == 1 -> a single outer product):
    #     xw[t, :] = sum_k x[t, k] * W_ih_scaled[k, :] + b_scaled
    # (L,1) lane-broadcast * (1,4*HP) sublane-broadcast -> (L, 4*HP); no MXU, no padding of x.
    xw = b_ref[...] + x_ref[:, 0:1] * wih_ref[0:1, :]
    for k in range(1, n_in):
        xw = xw + x_ref[:, k:k + 1] * wih_ref[k:k + 1, :]
    xw_scr[...] = xw

    # Recurrent state lives in vregs; loop is fully unrolled (L is static & small).
    h = jnp.zeros((1, Hp), jnp.float32)
    c = jnp.zeros((1, Hp), jnp.float32)

    # TODO(synk): stage W_hh in MXU weight registers (matmul_push_rhs once, then
    # matmul_acc_lhs/matmul_pop per step) once per-generation tiling can be validated;
    # it removes ~64 vregs/step of VMEM weight re-streaming from the serial h chain.
    for t in range(L):
        gates = (xw_scr[pl.ds(t, 1), :]
                 + jnp.dot(h, whh_ref[...],
                           preferred_element_type=jnp.float32))       # (1, 4*HP)
        # One fused tanh over all four gate blocks.  i/f/o columns were pre-scaled by
        # 0.5 at pack time, so sigmoid(z) = 0.5 * tanh_block + 0.5 exactly; the g block
        # is unscaled, so tanh_block IS tanh(g).
        act = jnp.tanh(gates)
        s_i = act[:, 0 * Hp:1 * Hp]
        s_f = act[:, 1 * Hp:2 * Hp]
        s_o = act[:, 2 * Hp:3 * Hp]
        t_g = act[:, 3 * Hp:4 * Hp]
        c = (0.5 * s_f + 0.5) * c + (0.5 * s_i + 0.5) * t_g
        h = (0.5 * s_o + 0.5) * jnp.tanh(c)

    # predictions[-1] == linear(h_L)
    out_ref[...] = (jnp.dot(h, wout_ref[...],
                            preferred_element_type=jnp.float32)
                    + bout_ref[...])


def make_params(key):
    """Deterministic PyTorch-style uniform(-1/sqrt(H), 1/sqrt(H)) init."""
    k = 1.0 / np.sqrt(HIDDEN)
    ks = jax.random.split(key, 6)
    w_ih = jax.random.uniform(ks[0], (4 * HIDDEN, INPUT), jnp.float32, -k, k)
    w_hh = jax.random.uniform(ks[1], (4 * HIDDEN, HIDDEN), jnp.float32, -k, k)
    b_ih = jax.random.uniform(ks[2], (4 * HIDDEN,), jnp.float32, -k, k)
    b_hh = jax.random.uniform(ks[3], (4 * HIDDEN,), jnp.float32, -k, k)
    w_out = jax.random.uniform(ks[4], (OUTPUT, HIDDEN), jnp.float32, -k, k)
    b_out = jax.random.uniform(ks[5], (OUTPUT,), jnp.float32, -k, k)
    return w_ih, w_hh, b_ih, b_hh, w_out, b_out


def pack_params(w_ih, w_hh, b_ih, b_hh, w_out, b_out):
    """Pad each gate block to HP lanes, transpose to (in, out), reorder gate blocks to
    (i, f, o, g), and fold the 0.5 sigmoid pre-scale into the i/f/o blocks of the
    weights and the combined bias."""
    wih_p = np.zeros((INPUT, 4 * HP), np.float32)
    whh_p = np.zeros((HP, 4 * HP), np.float32)
    b_p = np.zeros((1, 4 * HP), np.float32)
    w_ih = np.asarray(w_ih)
    w_hh = np.asarray(w_hh)
    b = np.asarray(b_ih) + np.asarray(b_hh)
    for dst, src in enumerate(GATE_SRC):
        scale = 0.5 if dst < 3 else 1.0     # blocks 0,1,2 = i,f,o (sigmoid); block 3 = g (tanh)
        wih_p[:, dst * HP:dst * HP + HIDDEN] = \
            scale * w_ih[src * HIDDEN:(src + 1) * HIDDEN, :].T
        whh_p[:HIDDEN, dst * HP:dst * HP + HIDDEN] = \
            scale * w_hh[src * HIDDEN:(src + 1) * HIDDEN, :].T
        b_p[0, dst * HP:dst * HP + HIDDEN] = scale * b[src * HIDDEN:(src + 1) * HIDDEN]
    wout_p = np.zeros((HP, OP), np.float32)
    wout_p[:HIDDEN, :OUTPUT] = np.asarray(w_out).T
    bout_p = np.zeros((1, OP), np.float32)
    bout_p[0, :OUTPUT] = np.asarray(b_out)
    return (jnp.asarray(wih_p), jnp.asarray(whh_p), jnp.asarray(b_p),
            jnp.asarray(wout_p), jnp.asarray(bout_p))


def lstm_forward(input_seq, params):
    """Mirrors LSTM.forward: input_seq is a 1-D sequence (L,), returns shape (OUTPUT,)."""
    L = input_seq.shape[0]
    x = input_seq.reshape(L, INPUT).astype(jnp.float32)   # no lane padding of x
    wih_p, whh_p, b_p, wout_p, bout_p = params

    out = pl.pallas_call(
        lstm_kernel,
        out_shape=jax.ShapeDtypeStruct((1, OP), jnp.float32),
        in_specs=[pl.BlockSpec(memory_space=pltpu.MemorySpace.VMEM)] * 6,
        out_specs=pl.BlockSpec(memory_space=pltpu.MemorySpace.VMEM),
        scratch_shapes=[pltpu.VMEM((L, 4 * HP), jnp.float32)],  # precomputed xW + b
    )(x, wih_p, whh_p, b_p, wout_p, bout_p)
    return out[0, :OUTPUT]


def ref_forward(input_seq, w_ih, w_hh, b_ih, b_hh, w_out, b_out):
    """Pure-JAX reference replicating torch.nn.LSTM + Linear semantics."""
    h = jnp.zeros((HIDDEN,), jnp.float32)
    c = jnp.zeros((HIDDEN,), jnp.float32)
    x = input_seq.reshape(-1, INPUT).astype(jnp.float32)
    for t in range(x.shape[0]):
        gates = w_ih @ x[t] + b_ih + w_hh @ h + b_hh
        i_g = jax.nn.sigmoid(gates[0 * HIDDEN:1 * HIDDEN])
        f_g = jax.nn.sigmoid(gates[1 * HIDDEN:2 * HIDDEN])
        g_g = jnp.tanh(gates[2 * HIDDEN:3 * HIDDEN])
        o_g = jax.nn.sigmoid(gates[3 * HIDDEN:4 * HIDDEN])
        c = f_g * c + i_g * g_g
        h = o_g * jnp.tanh(c)
    return w_out @ h + b_out


if __name__ == "__main__":
    key = jax.random.PRNGKey(0)
    pkey, xkey = jax.random.split(key)
    raw_params = make_params(pkey)
    params = pack_params(*raw_params)

    L = 8  # sequence length
    input_seq = jax.random.normal(xkey, (L,), jnp.float32)

    pred = lstm_forward(input_seq, params)
    pred = jax.block_until_ready(pred)

    ref = ref_forward(input_seq, *raw_params)
    np.testing.assert_allclose(np.asarray(pred), np.asarray(ref),
                               rtol=1e-5, atol=1e-5)
    print("KERNEL_OK")
</pallas_src>

<mosaic_0001>
module attributes {stable_mosaic.version = 11 : i64} {
  func.func @lstm_kernel(%arg0: memref<8x1xf32, #tpu.memory_space<vmem>>, %arg1: memref<1x512xf32, #tpu.memory_space<vmem>>, %arg2: memref<128x512xf32, #tpu.memory_space<vmem>>, %arg3: memref<1x512xf32, #tpu.memory_space<vmem>>, %arg4: memref<128x128xf32, #tpu.memory_space<vmem>>, %arg5: memref<1x128xf32, #tpu.memory_space<vmem>>, %arg6: memref<1x128xf32, #tpu.memory_space<vmem>>, %arg7: memref<8x512xf32, #tpu.memory_space<vmem>>) attributes {dimension_semantics = [], scalar_prefetch = 0 : i64, scratch_operands = 1 : i64, tpu.core_type = #tpu.core_type<tc>} {
    %c0 = arith.constant 0 : index
    %c0_0 = arith.constant 0 : index
    %0 = vector.load %arg3[%c0, %c0_0] : memref<1x512xf32, #tpu.memory_space<vmem>>, vector<1x512xf32>
    %c0_1 = arith.constant 0 : index
    %c0_2 = arith.constant 0 : index
    %1 = vector.load %arg0[%c0_1, %c0_2] : memref<8x1xf32, #tpu.memory_space<vmem>>, vector<8x1xf32>
    %c0_3 = arith.constant 0 : index
    %c0_4 = arith.constant 0 : index
    %2 = vector.load %arg1[%c0_3, %c0_4] : memref<1x512xf32, #tpu.memory_space<vmem>>, vector<1x512xf32>
    %3 = vector.broadcast %1 : vector<8x1xf32> to vector<8x512xf32>
    %4 = vector.broadcast %2 : vector<1x512xf32> to vector<8x512xf32>
    %5 = arith.mulf %3, %4 : vector<8x512xf32>
    %6 = vector.broadcast %0 : vector<1x512xf32> to vector<8x512xf32>
    %7 = arith.addf %6, %5 : vector<8x512xf32>
    %c0_5 = arith.constant 0 : index
    %c0_6 = arith.constant 0 : index
    %8 = vector.load %arg7[%c0_5, %c0_6] : memref<8x512xf32, #tpu.memory_space<vmem>>, vector<8x512xf32>
    tpu.vector_store %arg7[%c0_5, %c0_6], %7 {strides = array<i32>} : memref<8x512xf32, #tpu.memory_space<vmem>>, vector<8x512xf32>,
    %cst = arith.constant 0.000000e+00 : f32
    %9 = vector.broadcast %cst : f32 to vector<1x128xf32>
    %cst_7 = arith.constant 0.000000e+00 : f32
    %10 = vector.broadcast %cst_7 : f32 to vector<1x128xf32>
    %c0_8 = arith.constant 0 : index
    %c0_9 = arith.constant 0 : index
    %11 = vector.load %arg7[%c0_8, %c0_9] : memref<8x512xf32, #tpu.memory_space<vmem>>, vector<1x512xf32>
    %c0_10 = arith.constant 0 : index
    %c0_11 = arith.constant 0 : index
    %12 = vector.load %arg2[%c0_10, %c0_11] : memref<128x512xf32, #tpu.memory_space<vmem>>, vector<128x512xf32>
    %cst_12 = arith.constant dense<0.000000e+00> : vector<1x512xf32>
    %13 = tpu.matmul %9, %12, %cst_12 {dimension_numbers = #tpu.dot_dimension_numbers<[1], [0], [0], [1], [0, 0, 1, 1], [], []>} : vector<1x128xf32>, vector<128x512xf32>, vector<1x512xf32> -> vector<1x512xf32>
    %14 = arith.addf %11, %13 : vector<1x512xf32>
    %15 = math.tanh %14 : vector<1x512xf32>
    %16 = vector.extract_strided_slice %15 {offsets = [0, 0], sizes = [1, 128], strides = [1, 1]} : vector<1x512xf32> to vector<1x128xf32>
    %17 = vector.extract_strided_slice %15 {offsets = [0, 128], sizes = [1, 128], strides = [1, 1]} : vector<1x512xf32> to vector<1x128xf32>
    %18 = vector.extract_strided_slice %15 {offsets = [0, 256], sizes = [1, 128], strides = [1, 1]} : vector<1x512xf32> to vector<1x128xf32>
    %19 = vector.extract_strided_slice %15 {offsets = [0, 384], sizes = [1, 128], strides = [1, 1]} : vector<1x512xf32> to vector<1x128xf32>
    %cst_13 = arith.constant 5.000000e-01 : f32
    %20 = vector.broadcast %cst_13 : f32 to vector<1x128xf32>
    %21 = arith.mulf %20, %17 : vector<1x128xf32>
    %cst_14 = arith.constant 5.000000e-01 : f32
    %22 = vector.broadcast %cst_14 : f32 to vector<1x128xf32>
    %23 = arith.addf %21, %22 : vector<1x128xf32>
    %24 = arith.mulf %23, %10 : vector<1x128xf32>
    %cst_15 = arith.constant 5.000000e-01 : f32
    %25 = vector.broadcast %cst_15 : f32 to vector<1x128xf32>
    %26 = arith.mulf %25, %16 : vector<1x128xf32>
    %cst_16 = arith.constant 5.000000e-01 : f32
    %27 = vector.broadcast %cst_16 : f32 to vector<1x128xf32>
    %28 = arith.addf %26, %27 : vector<1x128xf32>
    %29 = arith.mulf %28, %19 : vector<1x128xf32>
    %30 = arith.addf %24, %29 : vector<1x128xf32>
    %cst_17 = arith.constant 5.000000e-01 : f32
    %31 = vector.broadcast %cst_17 : f32 to vector<1x128xf32>
    %32 = arith.mulf %31, %18 : vector<1x128xf32>
    %cst_18 = arith.constant 5.000000e-01 : f32
    %33 = vector.broadcast %cst_18 : f32 to vector<1x128xf32>
    %34 = arith.addf %32, %33 : vector<1x128xf32>
    %35 = math.tanh %30 : vector<1x128xf32>
    %36 = arith.mulf %34, %35 : vector<1x128xf32>
    %c1 = arith.constant 1 : index
    %c0_19 = arith.constant 0 : index
    %37 = vector.load %arg7[%c1, %c0_19] : memref<8x512xf32, #tpu.memory_space<vmem>>, vector<1x512xf32>
    %c0_20 = arith.constant 0 : index
    %c0_21 = arith.constant 0 : index
    %38 = vector.load %arg2[%c0_20, %c0_21] : memref<128x512xf32, #tpu.memory_space<vmem>>, vector<128x512xf32>
    %cst_22 = arith.constant dense<0.000000e+00> : vector<1x512xf32>
    %39 = tpu.matmul %36, %38, %cst_22 {dimension_numbers = #tpu.dot_dimension_numbers<[1], [0], [0], [1], [0, 0, 1, 1], [], []>} : vector<1x128xf32>, vector<128x512xf32>, vector<1x512xf32> -> vector<1x512xf32>
    %40 = arith.addf %37, %39 : vector<1x512xf32>
    %41 = math.tanh %40 : vector<1x512xf32>
    %42 = vector.extract_strided_slice %41 {offsets = [0, 0], sizes = [1, 128], strides = [1, 1]} : vector<1x512xf32> to vector<1x128xf32>
    %43 = vector.extract_strided_slice %41 {offsets = [0, 128], sizes = [1, 128], strides = [1, 1]} : vector<1x512xf32> to vector<1x128xf32>
    %44 = vector.extract_strided_slice %41 {offsets = [0, 256], sizes = [1, 128], strides = [1, 1]} : vector<1x512xf32> to vector<1x128xf32>
    %45 = vector.extract_strided_slice %41 {offsets = [0, 384], sizes = [1, 128], strides = [1, 1]} : vector<1x512xf32> to vector<1x128xf32>
    %cst_23 = arith.constant 5.000000e-01 : f32
    %46 = vector.broadcast %cst_23 : f32 to vector<1x128xf32>
    %47 = arith.mulf %46, %43 : vector<1x128xf32>
    %cst_24 = arith.constant 5.000000e-01 : f32
    %48 = vector.broadcast %cst_24 : f32 to vector<1x128xf32>
    %49 = arith.addf %47, %48 : vector<1x128xf32>
    %50 = arith.mulf %49, %30 : vector<1x128xf32>
    %cst_25 = arith.constant 5.000000e-01 : f32
    %51 = vector.broadcast %cst_25 : f32 to vector<1x128xf32>
    %52 = arith.mulf %51, %42 : vector<1x128xf32>
    %cst_26 = arith.constant 5.000000e-01 : f32
    %53 = vector.broadcast %cst_26 : f32 to vector<1x128xf32>
    %54 = arith.addf %52, %53 : vector<1x128xf32>
    %55 = arith.mulf %54, %45 : vector<1x128xf32>
    %56 = arith.addf %50, %55 : vector<1x128xf32>
    %cst_27 = arith.constant 5.000000e-01 : f32
    %57 = vector.broadcast %cst_27 : f32 to vector<1x128xf32>
    %58 = arith.mulf %57, %44 : vector<1x128xf32>
    %cst_28 = arith.constant 5.000000e-01 : f32
    %59 = vector.broadcast %cst_28 : f32 to vector<1x128xf32>
    %60 = arith.addf %58, %59 : vector<1x128xf32>
    %61 = math.tanh %56 : vector<1x128xf32>
    %62 = arith.mulf %60, %61 : vector<1x128xf32>
    %c2 = arith.constant 2 : index
    %c0_29 = arith.constant 0 : index
    %63 = vector.load %arg7[%c2, %c0_29] : memref<8x512xf32, #tpu.memory_space<vmem>>, vector<1x512xf32>
    %c0_30 = arith.constant 0 : index
    %c0_31 = arith.constant 0 : index
    %64 = vector.load %arg2[%c0_30, %c0_31] : memref<128x512xf32, #tpu.memory_space<vmem>>, vector<128x512xf32>
    %cst_32 = arith.constant dense<0.000000e+00> : vector<1x512xf32>
    %65 = tpu.matmul %62, %64, %cst_32 {dimension_numbers = #tpu.dot_dimension_numbers<[1], [0], [0], [1], [0, 0, 1, 1], [], []>} : vector<1x128xf32>, vector<128x512xf32>, vector<1x512xf32> -> vector<1x512xf32>
    %66 = arith.addf %63, %65 : vector<1x512xf32>
    %67 = math.tanh %66 : vector<1x512xf32>
    %68 = vector.extract_strided_slice %67 {offsets = [0, 0], sizes = [1, 128], strides = [1, 1]} : vector<1x512xf32> to vector<1x128xf32>
    %69 = vector.extract_strided_slice %67 {offsets = [0, 128], sizes = [1, 128], strides = [1, 1]} : vector<1x512xf32> to vector<1x128xf32>
    %70 = vector.extract_strided_slice %67 {offsets = [0, 256], sizes = [1, 128], strides = [1, 1]} : vector<1x512xf32> to vector<1x128xf32>
    %71 = vector.extract_strided_slice %67 {offsets = [0, 384], sizes = [1, 128], strides = [1, 1]} : vector<1x512xf32> to vector<1x128xf32>
    %cst_33 = arith.constant 5.000000e-01 : f32
    %72 = vector.broadcast %cst_33 : f32 to vector<1x128xf32>
    %73 = arith.mulf %72, %69 : vector<1x128xf32>
    %cst_34 = arith.constant 5.000000e-01 : f32
    %74 = vector.broadcast %cst_34 : f32 to vector<1x128xf32>
    %75 = arith.addf %73, %74 : vector<1x128xf32>
    %76 = arith.mulf %75, %56 : vector<1x128xf32>
    %cst_35 = arith.constant 5.000000e-01 : f32
    %77 = vector.broadcast %cst_35 : f32 to vector<1x128xf32>
    %78 = arith.mulf %77, %68 : vector<1x128xf32>
    %cst_36 = arith.constant 5.000000e-01 : f32
    %79 = vector.broadcast %cst_36 : f32 to vector<1x128xf32>
    %80 = arith.addf %78, %79 : vector<1x128xf32>
    %81 = arith.mulf %80, %71 : vector<1x128xf32>
    %82 = arith.addf %76, %81 : vector<1x128xf32>
    %cst_37 = arith.constant 5.000000e-01 : f32
    %83 = vector.broadcast %cst_37 : f32 to vector<1x128xf32>
    %84 = arith.mulf %83, %70 : vector<1x128xf32>
    %cst_38 = arith.constant 5.000000e-01 : f32
    %85 = vector.broadcast %cst_38 : f32 to vector<1x128xf32>
    %86 = arith.addf %84, %85 : vector<1x128xf32>
    %87 = math.tanh %82 : vector<1x128xf32>
    %88 = arith.mulf %86, %87 : vector<1x128xf32>
    %c3 = arith.constant 3 : index
    %c0_39 = arith.constant 0 : index
    %89 = vector.load %arg7[%c3, %c0_39] : memref<8x512xf32, #tpu.memory_space<vmem>>, vector<1x512xf32>
    %c0_40 = arith.constant 0 : index
    %c0_41 = arith.constant 0 : index
    %90 = vector.load %arg2[%c0_40, %c0_41] : memref<128x512xf32, #tpu.memory_space<vmem>>, vector<128x512xf32>
    %cst_42 = arith.constant dense<0.000000e+00> : vector<1x512xf32>
    %91 = tpu.matmul %88, %90, %cst_42 {dimension_numbers = #tpu.dot_dimension_numbers<[1], [0], [0], [1], [0, 0, 1, 1], [], []>} : vector<1x128xf32>, vector<128x512xf32>, vector<1x512xf32> -> vector<1x512xf32>
    %92 = arith.addf %89, %91 : vector<1x512xf32>
    %93 = math.tanh %92 : vector<1x512xf32>
    %94 = vector.extract_strided_slice %93 {offsets = [0, 0], sizes = [1, 128], strides = [1, 1]} : vector<1x512xf32> to vector<1x128xf32>
    %95 = vector.extract_strided_slice %93 {offsets = [0, 128], sizes = [1, 128], strides = [1, 1]} : vector<1x512xf32> to vector<1x128xf32>
    %96 = vector.extract_strided_slice %93 {offsets = [0, 256], sizes = [1, 128], strides = [1, 1]} : vector<1x512xf32> to vector<1x128xf32>
    %97 = vector.extract_strided_slice %93 {offsets = [0, 384], sizes = [1, 128], strides = [1, 1]} : vector<1x512xf32> to vector<1x128xf32>
    %cst_43 = arith.constant 5.000000e-01 : f32
    %98 = vector.broadcast %cst_43 : f32 to vector<1x128xf32>
    %99 = arith.mulf %98, %95 : vector<1x128xf32>
    %cst_44 = arith.constant 5.000000e-01 : f32
    %100 = vector.broadcast %cst_44 : f32 to vector<1x128xf32>
    %101 = arith.addf %99, %100 : vector<1x128xf32>
    %102 = arith.mulf %101, %82 : vector<1x128xf32>
    %cst_45 = arith.constant 5.000000e-01 : f32
    %103 = vector.broadcast %cst_45 : f32 to vector<1x128xf32>
    %104 = arith.mulf %103, %94 : vector<1x128xf32>
    %cst_46 = arith.constant 5.000000e-01 : f32
    %105 = vector.broadcast %cst_46 : f32 to vector<1x128xf32>
    %106 = arith.addf %104, %105 : vector<1x128xf32>
    %107 = arith.mulf %106, %97 : vector<1x128xf32>
    %108 = arith.addf %102, %107 : vector<1x128xf32>
    %cst_47 = arith.constant 5.000000e-01 : f32
    %109 = vector.broadcast %cst_47 : f32 to vector<1x128xf32>
    %110 = arith.mulf %109, %96 : vector<1x128xf32>
    %cst_48 = arith.constant 5.000000e-01 : f32
    %111 = vector.broadcast %cst_48 : f32 to vector<1x128xf32>
    %112 = arith.addf %110, %111 : vector<1x128xf32>
    %113 = math.tanh %108 : vector<1x128xf32>
    %114 = arith.mulf %112, %113 : vector<1x128xf32>
    %c4 = arith.constant 4 : index
    %c0_49 = arith.constant 0 : index
    %115 = vector.load %arg7[%c4, %c0_49] : memref<8x512xf32, #tpu.memory_space<vmem>>, vector<1x512xf32>
    %c0_50 = arith.constant 0 : index
    %c0_51 = arith.constant 0 : index
    %116 = vector.load %arg2[%c0_50, %c0_51] : memref<128x512xf32, #tpu.memory_space<vmem>>, vector<128x512xf32>
    %cst_52 = arith.constant dense<0.000000e+00> : vector<1x512xf32>
    %117 = tpu.matmul %114, %116, %cst_52 {dimension_numbers = #tpu.dot_dimension_numbers<[1], [0], [0], [1], [0, 0, 1, 1], [], []>} : vector<1x128xf32>, vector<128x512xf32>, vector<1x512xf32> -> vector<1x512xf32>
    %118 = arith.addf %115, %117 : vector<1x512xf32>
    %119 = math.tanh %118 : vector<1x512xf32>
    %120 = vector.extract_strided_slice %119 {offsets = [0, 0], sizes = [1, 128], strides = [1, 1]} : vector<1x512xf32> to vector<1x128xf32>
    %121 = vector.extract_strided_slice %119 {offsets = [0, 128], sizes = [1, 128], strides = [1, 1]} : vector<1x512xf32> to vector<1x128xf32>
    %122 = vector.extract_strided_slice %119 {offsets = [0, 256], sizes = [1, 128], strides = [1, 1]} : vector<1x512xf32> to vector<1x128xf32>
    %123 = vector.extract_strided_slice %119 {offsets = [0, 384], sizes = [1, 128], strides = [1, 1]} : vector<1x512xf32> to vector<1x128xf32>
    %cst_53 = arith.constant 5.000000e-01 : f32
    %124 = vector.broadcast %cst_53 : f32 to vector<1x128xf32>
    %125 = arith.mulf %124, %121 : vector<1x128xf32>
    %cst_54 = arith.constant 5.000000e-01 : f32
    %126 = vector.broadcast %cst_54 : f32 to vector<1x128xf32>
    %127 = arith.addf %125, %126 : vector<1x128xf32>
    %128 = arith.mulf %127, %108 : vector<1x128xf32>
    %cst_55 = arith.constant 5.000000e-01 : f32
    %129 = vector.broadcast %cst_55 : f32 to vector<1x128xf32>
    %130 = arith.mulf %129, %120 : vector<1x128xf32>
    %cst_56 = arith.constant 5.000000e-01 : f32
    %131 = vector.broadcast %cst_56 : f32 to vector<1x128xf32>
    %132 = arith.addf %130, %131 : vector<1x128xf32>
    %133 = arith.mulf %132, %123 : vector<1x128xf32>
    %134 = arith.addf %128, %133 : vector<1x128xf32>
    %cst_57 = arith.constant 5.000000e-01 : f32
    %135 = vector.broadcast %cst_57 : f32 to vector<1x128xf32>
    %136 = arith.mulf %135, %122 : vector<1x128xf32>
    %cst_58 = arith.constant 5.000000e-01 : f32
    %137 = vector.broadcast %cst_58 : f32 to vector<1x128xf32>
    %138 = arith.addf %136, %137 : vector<1x128xf32>
    %139 = math.tanh %134 : vector<1x128xf32>
    %140 = arith.mulf %138, %139 : vector<1x128xf32>
    %c5 = arith.constant 5 : index
    %c0_59 = arith.constant 0 : index
    %141 = vector.load %arg7[%c5, %c0_59] : memref<8x512xf32, #tpu.memory_space<vmem>>, vector<1x512xf32>
    %c0_60 = arith.constant 0 : index
    %c0_61 = arith.constant 0 : index
    %142 = vector.load %arg2[%c0_60, %c0_61] : memref<128x512xf32, #tpu.memory_space<vmem>>, vector<128x512xf32>
    %cst_62 = arith.constant dense<0.000000e+00> : vector<1x512xf32>
    %143 = tpu.matmul %140, %142, %cst_62 {dimension_numbers = #tpu.dot_dimension_numbers<[1], [0], [0], [1], [0, 0, 1, 1], [], []>} : vector<1x128xf32>, vector<128x512xf32>, vector<1x512xf32> -> vector<1x512xf32>
    %144 = arith.addf %141, %143 : vector<1x512xf32>
    %145 = math.tanh %144 : vector<1x512xf32>
    %146 = vector.extract_strided_slice %145 {offsets = [0, 0], sizes = [1, 128], strides = [1, 1]} : vector<1x512xf32> to vector<1x128xf32>
    %147 = vector.extract_strided_slice %145 {offsets = [0, 128], sizes = [1, 128], strides = [1, 1]} : vector<1x512xf32> to vector<1x128xf32>
    %148 = vector.extract_strided_slice %145 {offsets = [0, 256], sizes = [1, 128], strides = [1, 1]} : vector<1x512xf32> to vector<1x128xf32>
    %149 = vector.extract_strided_slice %145 {offsets = [0, 384], sizes = [1, 128], strides = [1, 1]} : vector<1x512xf32> to vector<1x128xf32>
    %cst_63 = arith.constant 5.000000e-01 : f32
    %150 = vector.broadcast %cst_63 : f32 to vector<1x128xf32>
    %151 = arith.mulf %150, %147 : vector<1x128xf32>
    %cst_64 = arith.constant 5.000000e-01 : f32
    %152 = vector.broadcast %cst_64 : f32 to vector<1x128xf32>
    %153 = arith.addf %151, %152 : vector<1x128xf32>
    %154 = arith.mulf %153, %134 : vector<1x128xf32>
    %cst_65 = arith.constant 5.000000e-01 : f32
    %155 = vector.broadcast %cst_65 : f32 to vector<1x128xf32>
    %156 = arith.mulf %155, %146 : vector<1x128xf32>
    %cst_66 = arith.constant 5.000000e-01 : f32
    %157 = vector.broadcast %cst_66 : f32 to vector<1x128xf32>
    %158 = arith.addf %156, %157 : vector<1x128xf32>
    %159 = arith.mulf %158, %149 : vector<1x128xf32>
    %160 = arith.addf %154, %159 : vector<1x128xf32>
    %cst_67 = arith.constant 5.000000e-01 : f32
    %161 = vector.broadcast %cst_67 : f32 to vector<1x128xf32>
    %162 = arith.mulf %161, %148 : vector<1x128xf32>
    %cst_68 = arith.constant 5.000000e-01 : f32
    %163 = vector.broadcast %cst_68 : f32 to vector<1x128xf32>
    %164 = arith.addf %162, %163 : vector<1x128xf32>
    %165 = math.tanh %160 : vector<1x128xf32>
    %166 = arith.mulf %164, %165 : vector<1x128xf32>
    %c6 = arith.constant 6 : index
    %c0_69 = arith.constant 0 : index
    %167 = vector.load %arg7[%c6, %c0_69] : memref<8x512xf32, #tpu.memory_space<vmem>>, vector<1x512xf32>
    %c0_70 = arith.constant 0 : index
    %c0_71 = arith.constant 0 : index
    %168 = vector.load %arg2[%c0_70, %c0_71] : memref<128x512xf32, #tpu.memory_space<vmem>>, vector<128x512xf32>
    %cst_72 = arith.constant dense<0.000000e+00> : vector<1x512xf32>
    %169 = tpu.matmul %166, %168, %cst_72 {dimension_numbers = #tpu.dot_dimension_numbers<[1], [0], [0], [1], [0, 0, 1, 1], [], []>} : vector<1x128xf32>, vector<128x512xf32>, vector<1x512xf32> -> vector<1x512xf32>
    %170 = arith.addf %167, %169 : vector<1x512xf32>
    %171 = math.tanh %170 : vector<1x512xf32>
    %172 = vector.extract_strided_slice %171 {offsets = [0, 0], sizes = [1, 128], strides = [1, 1]} : vector<1x512xf32> to vector<1x128xf32>
    %173 = vector.extract_strided_slice %171 {offsets = [0, 128], sizes = [1, 128], strides = [1, 1]} : vector<1x512xf32> to vector<1x128xf32>
    %174 = vector.extract_strided_slice %171 {offsets = [0, 256], sizes = [1, 128], strides = [1, 1]} : vector<1x512xf32> to vector<1x128xf32>
    %175 = vector.extract_strided_slice %171 {offsets = [0, 384], sizes = [1, 128], strides = [1, 1]} : vector<1x512xf32> to vector<1x128xf32>
    %cst_73 = arith.constant 5.000000e-01 : f32
    %176 = vector.broadcast %cst_73 : f32 to vector<1x128xf32>
    %177 = arith.mulf %176, %173 : vector<1x128xf32>
    %cst_74 = arith.constant 5.000000e-01 : f32
    %178 = vector.broadcast %cst_74 : f32 to vector<1x128xf32>
    %179 = arith.addf %177, %178 : vector<1x128xf32>
    %180 = arith.mulf %179, %160 : vector<1x128xf32>
    %cst_75 = arith.constant 5.000000e-01 : f32
    %181 = vector.broadcast %cst_75 : f32 to vector<1x128xf32>
    %182 = arith.mulf %181, %172 : vector<1x128xf32>
    %cst_76 = arith.constant 5.000000e-01 : f32
    %183 = vector.broadcast %cst_76 : f32 to vector<1x128xf32>
    %184 = arith.addf %182, %183 : vector<1x128xf32>
    %185 = arith.mulf %184, %175 : vector<1x128xf32>
    %186 = arith.addf %180, %185 : vector<1x128xf32>
    %cst_77 = arith.constant 5.000000e-01 : f32
    %187 = vector.broadcast %cst_77 : f32 to vector<1x128xf32>
    %188 = arith.mulf %187, %174 : vector<1x128xf32>
    %cst_78 = arith.constant 5.000000e-01 : f32
    %189 = vector.broadcast %cst_78 : f32 to vector<1x128xf32>
    %190 = arith.addf %188, %189 : vector<1x128xf32>
    %191 = math.tanh %186 : vector<1x128xf32>
    %192 = arith.mulf %190, %191 : vector<1x128xf32>
    %c7 = arith.constant 7 : index
    %c0_79 = arith.constant 0 : index
    %193 = vector.load %arg7[%c7, %c0_79] : memref<8x512xf32, #tpu.memory_space<vmem>>, vector<1x512xf32>
    %c0_80 = arith.constant 0 : index
    %c0_81 = arith.constant 0 : index
    %194 = vector.load %arg2[%c0_80, %c0_81] : memref<128x512xf32, #tpu.memory_space<vmem>>, vector<128x512xf32>
    %cst_82 = arith.constant dense<0.000000e+00> : vector<1x512xf32>
    %195 = tpu.matmul %192, %194, %cst_82 {dimension_numbers = #tpu.dot_dimension_numbers<[1], [0], [0], [1], [0, 0, 1, 1], [], []>} : vector<1x128xf32>, vector<128x512xf32>, vector<1x512xf32> -> vector<1x512xf32>
    %196 = arith.addf %193, %195 : vector<1x512xf32>
    %197 = math.tanh %196 : vector<1x512xf32>
    %198 = vector.extract_strided_slice %197 {offsets = [0, 0], sizes = [1, 128], strides = [1, 1]} : vector<1x512xf32> to vector<1x128xf32>
    %199 = vector.extract_strided_slice %197 {offsets = [0, 128], sizes = [1, 128], strides = [1, 1]} : vector<1x512xf32> to vector<1x128xf32>
    %200 = vector.extract_strided_slice %197 {offsets = [0, 256], sizes = [1, 128], strides = [1, 1]} : vector<1x512xf32> to vector<1x128xf32>
    %201 = vector.extract_strided_slice %197 {offsets = [0, 384], sizes = [1, 128], strides = [1, 1]} : vector<1x512xf32> to vector<1x128xf32>
    %cst_83 = arith.constant 5.000000e-01 : f32
    %202 = vector.broadcast %cst_83 : f32 to vector<1x128xf32>
    %203 = arith.mulf %202, %199 : vector<1x128xf32>
    %cst_84 = arith.constant 5.000000e-01 : f32
    %204 = vector.broadcast %cst_84 : f32 to vector<1x128xf32>
    %205 = arith.addf %203, %204 : vector<1x128xf32>
    %206 = arith.mulf %205, %186 : vector<1x128xf32>
    %cst_85 = arith.constant 5.000000e-01 : f32
    %207 = vector.broadcast %cst_85 : f32 to vector<1x128xf32>
    %208 = arith.mulf %207, %198 : vector<1x128xf32>
    %cst_86 = arith.constant 5.000000e-01 : f32
    %209 = vector.broadcast %cst_86 : f32 to vector<1x128xf32>
    %210 = arith.addf %208, %209 : vector<1x128xf32>
    %211 = arith.mulf %210, %201 : vector<1x128xf32>
    %212 = arith.addf %206, %211 : vector<1x128xf32>
    %cst_87 = arith.constant 5.000000e-01 : f32
    %213 = vector.broadcast %cst_87 : f32 to vector<1x128xf32>
    %214 = arith.mulf %213, %200 : vector<1x128xf32>
    %cst_88 = arith.constant 5.000000e-01 : f32
    %215 = vector.broadcast %cst_88 : f32 to vector<1x128xf32>
    %216 = arith.addf %214, %215 : vector<1x128xf32>
    %217 = math.tanh %212 : vector<1x128xf32>
    %218 = arith.mulf %216, %217 : vector<1x128xf32>
    %c0_89 = arith.constant 0 : index
    %c0_90 = arith.constant 0 : index
    %219 = vector.load %arg4[%c0_89, %c0_90] : memref<128x128xf32, #tpu.memory_space<vmem>>, vector<128x128xf32>
    %cst_91 = arith.constant dense<0.000000e+00> : vector<1x128xf32>
    %220 = tpu.matmul %218, %219, %cst_91 {dimension_numbers = #tpu.dot_dimension_numbers<[1], [0], [0], [1], [0, 0, 1, 1], [], []>} : vector<1x128xf32>, vector<128x128xf32>, vector<1x128xf32> -> vector<1x128xf32>
    %c0_92 = arith.constant 0 : index
    %c0_93 = arith.constant 0 : index
    %221 = vector.load %arg5[%c0_92, %c0_93] : memref<1x128xf32, #tpu.memory_space<vmem>>, vector<1x128xf32>
    %222 = arith.addf %220, %221 : vector<1x128xf32>
    %c0_94 = arith.constant 0 : index
    %c0_95 = arith.constant 0 : index
    %223 = vector.load %arg6[%c0_94, %c0_95] : memref<1x128xf32, #tpu.memory_space<vmem>>, vector<1x128xf32>
    tpu.vector_store %arg6[%c0_94, %c0_95], %222 {strides = array<i32>} : memref<1x128xf32, #tpu.memory_space<vmem>>, vector<1x128xf32>,
    return
  }
}

</mosaic_0001>

<bundles_post_ra>
// kernel: tpu_custom_call.1
= control target key start
LH: loop header
LB: loop body
LE: loop exit
PB: predicated region body
PF: predicated region fallthrough
CT: control target
= control target key end

     0   :  { %11 = vsyncpa [#allocation4], 0  ;;  %s3014_s0 = inlined_call_operand.vmem [shape: f32[8,1], index: 0, kind: input, shape index: {}]   ;;  %s3015_s1 = inlined_call_operand.vmem [shape: f32[1,512], index: 1, kind: input, shape index: {}]   ;;  %s3016_s2 = inlined_call_operand.hbm [shape: f32[128,512], index: 2, kind: input, shape index: {}]   ;;  %s3017_s3 = inlined_call_operand.vmem [shape: f32[1,512], index: 3, kind: input, shape index: {}]   ;;  %s3018_s4 = inlined_call_operand.hbm [shape: f32[128,128], index: 4, kind: input, shape index: {}]   ;;  %s3019_s5 = inlined_call_operand.vmem [shape: f32[1,128], index: 5, kind: input, shape index: {}]   ;;  %s3020_s6 = inlined_call_operand.hbm [shape: f32[1,128], index: 6, kind: output, shape index: {}]  }
   0x1   :  { %12 = vsyncpa [#allocation7], 0 }
   0x2   :  { %13 = vsyncpa [#allocation5], 0  ;;  %s2530_s21 = smov [#allocation3]   ;;  %s2458_s25 = scalar_lea.hbm %s3016_s2, 8192 }
   0x3   :  { %s23_s22 = sshll.u32 %s2530_s21, 4  ;;  %p2459_p0 = scmp.ne.s32.totalorder %s3016_s2, %s2458_s25  ;;  %s24_s22 = int_to_ptr.vmem [resolvable:$true] %s23_s22 }
   0x4   :  { %p2462_p1 = scmp.lt.u32.totalorder %s2458_s25, %s3016_s2 }
   0x6   :  { %p2464_p2 = pnand %p2462_p1, %p2459_p0 }
   0x8   :  { %2467 = shalt.err (!%p2464_p2)
}
   0x9   :  { %s2468_s30 = scalar_lea.vmem %s24_s22, 8192  ;;  %p2473_p4 = scmp.lt.s32.totalorder %s24_s22, %s24_s22 }
   0xa   :  { %p2469_p3 = scmp.ne.s32.totalorder %s24_s22, %s2468_s30  ;;  %p2474_p5 = scmp.lt.s32.totalorder %s2468_s30, %s2468_s30 }
   0xc   :  { %p2475_p6 = por %p2474_p5, %p2473_p4 }
   0xe   :  { %p2476_p7 = pnand %p2475_p6, %p2469_p3 }
  0x10   :  { %2479 = shalt.err (!%p2476_p7)
}
  0x11   :  { %s2531_s7 = smov 512   ;;  %s2532_s8 = smov 32  }
  0x12   :  { %29 = dma.hbm_to_vmem [thread:$0]  %s3016_s2, 8192, %s24_s22, [#allocation4], %s2531_s7, %s2531_s7, %s2532_s8  }
  0x13   :  { %s2533_s11 = smov [#allocation6]   ;;  %s2480_s15 = scalar_lea.hbm %s3018_s4, 2048 }
  0x14   :  { %s37_s12 = sshll.u32 %s2533_s11, 4  ;;  %p2481_p8 = scmp.ne.s32.totalorder %s3018_s4, %s2480_s15  ;;  %s38_s12 = int_to_ptr.vmem [resolvable:$true] %s37_s12 }
  0x15   :  { %p2484_p9 = scmp.lt.u32.totalorder %s2480_s15, %s3018_s4 }
  0x17   :  { %p2486_p10 = pnand %p2484_p9, %p2481_p8 }
  0x19   :  { %2489 = shalt.err (!%p2486_p10)
}
  0x1a   :  { %s2490_s20 = scalar_lea.vmem %s38_s12, 2048  ;;  %p2495_p12 = scmp.lt.s32.totalorder %s38_s12, %s38_s12 }
  0x1b   :  { %p2491_p11 = scmp.ne.s32.totalorder %s38_s12, %s2490_s20  ;;  %p2496_p13 = scmp.lt.s32.totalorder %s2490_s20, %s2490_s20 }
  0x1d   :  { %p2497_p0 = por %p2496_p13, %p2495_p12 }
  0x1f   :  { %p2498_p1 = pnand %p2497_p0, %p2491_p11 }
  0x21   :  { %2501 = shalt.err (!%p2498_p1)
}
  0x22   :  { %s2534_s2 = smov 128   ;;  %s2535_s21 = smov 8  }
  0x23   :  { %43 = dma.hbm_to_vmem [thread:$0]  %s3018_s4, 2048, %s38_s12, [#allocation7], %s2534_s2, %s2534_s2, %s2535_s21  }
  0x24   :  { %2524 = dma.done.wait [#allocation4], 8192  }
  0x25   :  { %2525 = vsyncadd [#allocation4], 4294959104 }
  0x26   :  { %2526 = dma.done.wait [#allocation7], 2048  }
  0x27   :  { %2527 = vsyncadd [#allocation7], 4294965248  ;;  %v2536_v0 = vmov 0.0   ;;  %v2537_v1 = vmov 0   ;;  %v116_v2 = vld [vmem:[#allocation3 + $0x8] sm:$0xff]  ;;  %v118_v4 = vld [vmem:[#allocation3 + $0x18] sm:$0xff] }
  0x28   :  { %243 = vmatprep.mubr.f32.mxu0 %v2536_v0  ;;  %314 = vmatprep.mubr.f32.mxu1 %v2536_v0  ;;  %v120_v3 = vld [vmem:[#allocation3 + $0x28] sm:$0xff]  ;;  %v122_v6 = vld [vmem:[#allocation3 + $0x38] sm:$0xff]  ;;  %v115_v7 = vld [vmem:[#allocation3] sm:$0xff]  ;;  %vm2540_vm0 = vmmov 0   ;;  %s2541_s28 = smov [#allocation8]  }
  0x29   :  { %2425 = vset.pattern.permute.xlu0 %v2537_v1  ;;  %v2603_v5 = vpack.c.bf16 %v120_v3, %v116_v2  ;;  %v119_v8 = vld [vmem:[#allocation3 + $0x20] sm:$0xff]  ;;  %v2605_v9 = vpack.c.bf16 %v122_v6, %v118_v4  ;;  %v117_v11 = vld [vmem:[#allocation3 + $0x10] sm:$0xff]  ;;  %v124_v13 = vld [vmem:[#allocation3 + $0x48] sm:$0xff]  ;;  %s1815_s29 = sshll.u32 %s2541_s28, 4  ;;  %s1816_s29 = int_to_ptr.vmem [resolvable:$true] %s1815_s29 }
  0x2a   :  { %v2607_v10 = vpack.c.bf16 %v119_v8, %v115_v7  ;;  %v121_v12 = vld [vmem:[#allocation3 + $0x30] sm:$0xff]  ;;  %v128_v15 = vld [vmem:[#allocation3 + $0x68] sm:$0xff]  ;;  %v126_v16 = vld [vmem:[#allocation3 + $0x58] sm:$0xff]  ;;  %s2502_s30 = scalar_lea.vmem %s1816_s29, 16  ;;  %s2506_s7 = scalar_lea.vmem %s1816_s29, 32 }
  0x2b   :  { %1878 = vmatprep.subr.bf16.mxu0 %v2603_v5  ;;  %v2610_v14 = vpack.c.bf16 %v121_v12, %v117_v11  ;;  %v130_v17 = vld [vmem:[#allocation3 + $0x78] sm:$0xff]  ;;  %1910 = vmatprep.subr.bf16.mxu1 %v2605_v9  ;;  %v2614_v18 = vpack.c.bf16 %v128_v15, %v124_v13  ;;  %v123_v20 = vld [vmem:[#allocation3 + $0x40] sm:$0xff]  ;;  %v125_v22 = vld [vmem:[#allocation3 + $0x50] sm:$0xff]  ;;  %p2503_p2 = scmp.ne.s32.totalorder %s1816_s29, %s2502_s30  ;;  %p2507_p3 = scmp.lt.s32.totalorder %s1816_s29, %s1816_s29 }
  0x2c   :  { %1880 = vmatpush1.bf16.msra.mxu0 %v2607_v10  ;;  %v2616_v19 = vpack.c.bf16 %v130_v17, %v126_v16  ;;  %v127_v21 = vld [vmem:[#allocation3 + $0x60] sm:$0xff]  ;;  %v129_v24 = vld [vmem:[#allocation3 + $0x70] sm:$0xff]  ;;  %v132_v25 = vld [vmem:[#allocation3 + $0x88] sm:$0xff]  ;;  %p2508_p4 = scmp.lt.s32.totalorder %s2506_s7, %s2502_s30 }
  0x2d   :  { %1912 = vmatpush1.bf16.msra.mxu1 %v2610_v14  ;;  %v2619_v23 = vpack.c.bf16 %v127_v21, %v123_v20  ;;  %v136_v26 = vld [vmem:[#allocation3 + $0xa8] sm:$0xff]  ;;  %1882 = vmatprep.subr.bf16.mxu0 %v2614_v18  ;;  %v2623_v27 = vpack.c.bf16 %v129_v24, %v125_v22  ;;  %v134_v29 = vld [vmem:[#allocation3 + $0x98] sm:$0xff]  ;;  %v131_v31 = vld [vmem:[#allocation3 + $0x80] sm:$0xff] }
  0x2e   :  { %1914 = vmatprep.subr.bf16.mxu1 %v2616_v19  ;;  %v2625_v28 = vpack.c.bf16 %v136_v26, %v132_v25  ;;  %v138_v30 = vld [vmem:[#allocation3 + $0xb8] sm:$0xff]  ;;  %v135_v33 = vld [vmem:[#allocation3 + $0xa0] sm:$0xff]  ;;  %v133_v34 = vld [vmem:[#allocation3 + $0x90] sm:$0xff]  ;;  %p2509_p5 = por %p2508_p4, %p2507_p3 }
  0x2f   :  { %v2627_v32 = vpack.c.bf16 %v138_v30, %v134_v29  ;;  %v137_v35 = vld [vmem:[#allocation3 + $0xb0] sm:$0xff]  ;;  %v2630_v36 = vpack.c.bf16 %v135_v33, %v131_v31  ;;  %v140_v37 = vld [vmem:[#allocation3 + $0xc8] sm:$0xff]  ;;  %v142_v39 = vld [vmem:[#allocation3 + $0xd8] sm:$0xff] }
  0x30   :  { %1884 = vmatpush1.bf16.msra.mxu0 %v2619_v23  ;;  %v144_v38 = vld [vmem:[#allocation3 + $0xe8] sm:$0xff]  ;;  %v2634_v40 = vpack.c.bf16 %v137_v35, %v133_v34  ;;  %v146_v42 = vld [vmem:[#allocation3 + $0xf8] sm:$0xff]  ;;  %v139_v43 = vld [vmem:[#allocation3 + $0xc0] sm:$0xff]  ;;  %p2510_p6 = pnand %p2509_p5, %p2503_p2 }
  0x31   :  { %1916 = vmatpush1.bf16.msra.mxu1 %v2623_v27  ;;  %1886 = vmatprep.subr.bf16.mxu0 %v2625_v28  ;;  %v2636_v41 = vpack.c.bf16 %v144_v38, %v140_v37  ;;  %v143_v44 = vld [vmem:[#allocation3 + $0xe0] sm:$0xff]  ;;  %v2639_v45 = vpack.c.bf16 %v146_v42, %v142_v39  ;;  %v141_v46 = vld [vmem:[#allocation3 + $0xd0] sm:$0xff]  ;;  %v148_v48 = vld [vmem:[#allocation3 + $0x108] sm:$0xff] }
  0x32   :  { %1918 = vmatprep.subr.bf16.mxu1 %v2627_v32  ;;  %v145_v47 = vld [vmem:[#allocation3 + $0xf0] sm:$0xff]  ;;  %v152_v49 = vld [vmem:[#allocation3 + $0x128] sm:$0xff]  ;;  %v150_v50 = vld [vmem:[#allocation3 + $0x118] sm:$0xff]  ;;  %v2642_v52 = vpack.c.bf16 %v143_v44, %v139_v43 }
  0x33   :  { %v154_v51 = vld [vmem:[#allocation3 + $0x138] sm:$0xff]  ;;  %v2646_v53 = vpack.c.bf16 %v145_v47, %v141_v46  ;;  %v2648_v54 = vpack.c.bf16 %v152_v49, %v148_v48  ;;  %v147_v55 = vld [vmem:[#allocation3 + $0x100] sm:$0xff]  ;;  %v149_v57 = vld [vmem:[#allocation3 + $0x110] sm:$0xff] }
  0x34   :  { %1888 = vmatpush1.bf16.msra.mxu0 %v2630_v36  ;;  %v151_v56 = vld [vmem:[#allocation3 + $0x120] sm:$0xff]  ;;  %v2651_v58 = vpack.c.bf16 %v154_v51, %v150_v50  ;;  %v153_v59 = vld [vmem:[#allocation3 + $0x130] sm:$0xff]  ;;  %v156_v60 = vld [vmem:[#allocation3 + $0x148] sm:$0xff]  ;;  %v61_v50 = vlaneseq }
  0x35   :  { %1920 = vmatpush1.bf16.msra.mxu1 %v2634_v40  ;;  %1890 = vmatprep.subr.bf16.mxu0 %v2636_v41  ;;  %v160_v61 = vld [vmem:[#allocation3 + $0x168] sm:$0xff]  ;;  %v158_v62 = vld [vmem:[#allocation3 + $0x158] sm:$0xff]  ;;  %v2654_v1 = vpack.c.bf16 %v151_v56, %v147_v55  ;;  %v2658_v2 = vpack.c.bf16 %v153_v59, %v149_v57  ;;  %v155_v4 = vld [vmem:[#allocation3 + $0x140] sm:$0xff] }
  0x36   :  { %1922 = vmatprep.subr.bf16.mxu1 %v2639_v45  ;;  %v162_v63 = vld [vmem:[#allocation3 + $0x178] sm:$0xff]  ;;  %v2660_v3 = vpack.c.bf16 %v160_v61, %v156_v60  ;;  %v159_v6 = vld [vmem:[#allocation3 + $0x160] sm:$0xff]  ;;  %v157_v7 = vld [vmem:[#allocation3 + $0x150] sm:$0xff]  ;;  %v62_v51 = vshrl.u32 %v61_v50, 7 }
  0x37   :  { %v2663_v8 = vpack.c.bf16 %v162_v63, %v158_v62  ;;  %v161_v11 = vld [vmem:[#allocation3 + $0x170] sm:$0xff]  ;;  %v164_v12 = vld [vmem:[#allocation3 + $0x188] sm:$0xff]  ;;  %v166_v15 = vld [vmem:[#allocation3 + $0x198] sm:$0xff]  ;;  %v2666_v17 = vpack.c.bf16 %v159_v6, %v155_v4 }
  0x38   :  { %1892 = vmatpush1.bf16.msra.mxu0 %v2642_v52  ;;  %v168_v13 = vld [vmem:[#allocation3 + $0x1a8] sm:$0xff]  ;;  %v170_v16 = vld [vmem:[#allocation3 + $0x1b8] sm:$0xff]  ;;  %v163_v20 = vld [vmem:[#allocation3 + $0x180] sm:$0xff]  ;;  %v2670_v21 = vpack.c.bf16 %v161_v11, %v157_v7  ;;  %v63_v55 = vsub.s32 0, %v62_v51  ;;  %v67_v56 = vsub.s32 1, %v62_v51  ;;  %v71_v57 = vsub.s32 2, %v62_v51 }
  0x39   :  { %1924 = vmatpush1.bf16.msra.mxu1 %v2646_v53  ;;  %1894 = vmatprep.subr.bf16.mxu0 %v2648_v54  ;;  %v2672_v22 = vpack.c.bf16 %v168_v13, %v164_v12  ;;  %v167_v24 = vld [vmem:[#allocation3 + $0x1a0] sm:$0xff]  ;;  %v165_v25 = vld [vmem:[#allocation3 + $0x190] sm:$0xff]  ;;  %v2678_v29 = vpack.c.bf16 %v170_v16, %v166_v15  ;;  %v172_v31 = vld [vmem:[#allocation3 + $0x1c8] sm:$0xff]  ;;  %v75_v59 = vsub.s32 3, %v62_v51 }
  0x3a   :  { %1926 = vmatprep.subr.bf16.mxu1 %v2651_v58  ;;  %v53_v26 = vld [vmem:[%s3014_s0] sm:$0xff]  ;;  %v169_v30 = vld [vmem:[#allocation3 + $0x1b0] sm:$0xff]  ;;  %v176_v33 = vld [vmem:[#allocation3 + $0x1e8] sm:$0xff]  ;;  %v2681_v37 = vpack.c.bf16 %v167_v24, %v163_v20 }
  0x3b   :  { %57 = vperm.xlu0 %2425, %v53_v26   ;;  %v174_v34 = vld [vmem:[#allocation3 + $0x1d8] sm:$0xff]  ;;  %v2685_v38 = vpack.c.bf16 %v169_v30, %v165_v25  ;;  %v2687_v39 = vpack.c.bf16 %v176_v33, %v172_v31  ;;  %v171_v42 = vld [vmem:[#allocation3 + $0x1c0] sm:$0xff]  ;;  %v173_v46 = vld [vmem:[#allocation3 + $0x1d0] sm:$0xff] }
  0x3c   :  { %1896 = vmatpush1.bf16.msra.mxu0 %v2654_v1  ;;  %v178_v35 = vld [vmem:[#allocation3 + $0x1f8] sm:$0xff]  ;;  %v175_v43 = vld [vmem:[#allocation3 + $0x1e0] sm:$0xff]  ;;  %v177_v47 = vld [vmem:[#allocation3 + $0x1f0] sm:$0xff] }
  0x3d   :  { %1928 = vmatpush1.bf16.msra.mxu1 %v2658_v2  ;;  %1898 = vmatprep.subr.bf16.mxu0 %v2660_v3  ;;  %v2690_v44 = vpack.c.bf16 %v178_v35, %v174_v34  ;;  %v2693_v48 = vpack.c.bf16 %v175_v43, %v171_v42  ;;  %v2697_v49 = vpack.c.bf16 %v177_v47, %v173_v46  ;;  %v54_v60 = vld [vmem:[%s3015_s1] sm:$0xf]  ;;  %v2538_v34 = vmov 1966171168  }
  0x3e   :  { %1930 = vmatprep.subr.bf16.mxu1 %v2663_v8  ;;  %v52_v61 = vld [vmem:[%s3017_s3] sm:$0xf]  ;;  %v64_v62 = vrot.slane %v54_v60, %v63_v55  ;;  %v68_v63 = vrot.slane %v54_v60, %v67_v56  ;;  %v72_v4 = vrot.slane %v54_v60, %v71_v57  ;;  %v76_v6 = vrot.slane %v54_v60, %v75_v59 }
  0x3f   :  { %v89_v7 = vrot.slane %v52_v61, %v63_v55  ;;  %v93_v11 = vrot.slane %v52_v61, %v67_v56  ;;  %v97_v12 = vrot.slane %v52_v61, %v71_v57  ;;  %v101_v13 = vrot.slane %v52_v61, %v75_v59 }
  0x40   :  { %1900 = vmatpush1.bf16.msra.mxu0 %v2666_v17  ;;  %v328_v35 = vunpack.c.l.s4 %v2538_v34 }
  0x41   :  { %1932 = vmatpush1.bf16.msra.mxu1 %v2670_v21  ;;  %1902 = vmatprep.subr.bf16.mxu0 %v2672_v22 }
  0x42   :  { %1934 = vmatprep.subr.bf16.mxu1 %v2678_v29  ;;  %v329_v42 = vunpack.c.0.s8 %v328_v35 }
  0x44   :  { %1904 = vmatpush1.bf16.msra.mxu0 %v2681_v37  ;;  %v2746_v43 = vsub.s32 %v329_v42, %v62_v51 }
  0x45   :  { %1936 = vmatpush1.bf16.msra.mxu1 %v2685_v38  ;;  %1906 = vmatprep.subr.bf16.mxu0 %v2687_v39 }
  0x46   :  { %1938 = vmatprep.subr.bf16.mxu1 %v2690_v44 }
  0x48   :  { %1908 = vmatpush1.bf16.msra.mxu0 %v2693_v48 }
  0x49   :  { %1940 = vmatpush1.bf16.msra.mxu1 %v2697_v49  ;;  %1942 = vmatprep.subr.bf16.mxu0 %v2603_v5 }
  0x4a   :  { %1974 = vmatprep.subr.bf16.mxu1 %v2605_v9 }
  0x4b   :  { %244 = vmatmul.mubr.f32.vlgmr.msra.gmra.mrb[0].mxu0 %v2536_v0 }
  0x4c   :  { %315 = vmatmul.mubr.f32.vlgmr.msra.gmra.mrb[0].mxu1 %v2536_v0  ;;  %1944 = vmatpush1.bf16.msra.mxu0 %v2607_v10 }
  0x4d   :  { %1976 = vmatpush1.bf16.msra.mxu1 %v2610_v14  ;;  %1946 = vmatprep.subr.bf16.mxu0 %v2614_v18 }
  0x4e   :  { %1978 = vmatprep.subr.bf16.mxu1 %v2616_v19  ;;  %436 = vmatprep.mubr.f32.mxu0 %v2536_v0 }
  0x4f   :  { %507 = vmatprep.mubr.f32.mxu1 %v2536_v0 }
  0x50   :  { %1948 = vmatpush1.bf16.msra.mxu0 %v2619_v23 }
  0x51   :  { %1980 = vmatpush1.bf16.msra.mxu1 %v2623_v27  ;;  %1950 = vmatprep.subr.bf16.mxu0 %v2625_v28 }
  0x52   :  { %1982 = vmatprep.subr.bf16.mxu1 %v2627_v32 }
  0x54   :  { %1952 = vmatpush1.bf16.msra.mxu0 %v2630_v36 }
  0x55   :  { %1984 = vmatpush1.bf16.msra.mxu1 %v2634_v40  ;;  %1954 = vmatprep.subr.bf16.mxu0 %v2636_v41 }
  0x56   :  { %1986 = vmatprep.subr.bf16.mxu1 %v2639_v45 }
  0x58   :  { %1956 = vmatpush1.bf16.msra.mxu0 %v2642_v52 }
  0x59   :  { %1988 = vmatpush1.bf16.msra.mxu1 %v2646_v53  ;;  %1958 = vmatprep.subr.bf16.mxu0 %v2648_v54 }
  0x5a   :  { %1990 = vmatprep.subr.bf16.mxu1 %v2651_v58 }
  0x5c   :  { %1960 = vmatpush1.bf16.msra.mxu0 %v2654_v1 }
  0x5d   :  { %1992 = vmatpush1.bf16.msra.mxu1 %v2658_v2  ;;  %1962 = vmatprep.subr.bf16.mxu0 %v2660_v3 }
  0x5e   :  { %1994 = vmatprep.subr.bf16.mxu1 %v2663_v8 }
  0x60   :  { %1964 = vmatpush1.bf16.msra.mxu0 %v2666_v17 }
  0x61   :  { %1996 = vmatpush1.bf16.msra.mxu1 %v2670_v21  ;;  %1966 = vmatprep.subr.bf16.mxu0 %v2672_v22 }
  0x62   :  { %1998 = vmatprep.subr.bf16.mxu1 %v2678_v29 }
  0x64   :  { %1968 = vmatpush1.bf16.msra.mxu0 %v2681_v37 }
  0x65   :  { %2000 = vmatpush1.bf16.msra.mxu1 %v2685_v38  ;;  %1970 = vmatprep.subr.bf16.mxu0 %v2687_v39 }
  0x66   :  { %2002 = vmatprep.subr.bf16.mxu1 %v2690_v44 }
  0x68   :  { %1972 = vmatpush1.bf16.msra.mxu0 %v2693_v48 }
  0x69   :  { %2004 = vmatpush1.bf16.msra.mxu1 %v2697_v49  ;;  %2006 = vmatprep.subr.bf16.mxu0 %v2603_v5 }
  0x6a   :  { %2038 = vmatprep.subr.bf16.mxu1 %v2605_v9 }
  0xba   :  { %v58_v15 = vpop.permute.xlu0 %57 }
  0xbb   :  { %v81_v16 = vmul.f32 %v64_v62, %v58_v15  ;;  %v82_v20 = vmul.f32 %v68_v63, %v58_v15  ;;  %v83_v24 = vmul.f32 %v72_v4, %v58_v15  ;;  %v84_v25 = vmul.f32 %v76_v6, %v58_v15 }
  0xbd   :  { %v106_v26 = vadd.f32 %v89_v7, %v81_v16  ;;  %v107_v30 = vadd.f32 %v93_v11, %v82_v20  ;;  %v108_v31 = vadd.f32 %v97_v12, %v83_v24  ;;  %v109_v33 = vadd.f32 %v101_v13, %v84_v25 }
  0xbf   :  { %110 = vst [vmem:[#allocation2] sm:$0xff] %v106_v26  ;;  %111 = vst [vmem:[#allocation2 + $0x8] sm:$0xff] %v107_v30 }
  0xc0   :  { %112 = vst [vmem:[#allocation2 + $0x10] sm:$0xff] %v108_v31  ;;  %113 = vst [vmem:[#allocation2 + $0x18] sm:$0xff] %v109_v33 }
  0xc7   :  { %v114_v62 = vld [vmem:[#allocation2] ss:$8 sm:$0xf] }
 0x11e   :  { %v245_v46 = vpop.f32.mrb[0].mxu0 }
 0x11f   :  { %v316_v47 = vpop.f32.mrb[0].mxu1  ;;  %v247_v50 = vpop.f32.mrb[1].mxu0 }
 0x120   :  { %v325_v55 = vcombine.low %v245_v46, %v247_v50  ;;  %v318_v56 = vpop.f32.mrb[1].mxu1 }
 0x121   :  { %v326_v57 = vcombine.low %v316_v47, %v318_v56 }
 0x122   :  { %v333_v59 = vrot.slane %v325_v55, %v2746_v43 }
 0x123   :  { %v340_v60 = vrot.slane %v326_v57, %v2746_v43 }
 0x125   :  { %v341_v61 = vcombine.low %v333_v59, %v340_v60  ;;  %v371_v60 = vld [vmem:[#allocation2 + $0x1] ss:$8 sm:$0xf] }
 0x127   :  { %v348_v63 = vrot.slane %v341_v61, %v2746_v43 }
 0x129   :  { %v350_v4 = vadd.f32 %v348_v63, %v114_v62 }
 0x12b   :  { %2426 = vtanh.f32 %v350_v4 }
 0x135   :  { %v2427_v6 = vpop.eup %2426 }
 0x136   :  { %v353_v7 = vrot.slane %v2427_v6, 1  ;;  %v358_v51 = vmul.f32 0.5, %v2427_v6  ;;  %v360_v15 = vrot.slane %v2427_v6, 3  ;;  %v364_v25 = vrot.slane %v2427_v6, 2 }
 0x138   :  { %v355_v11 = vmul.f32 0.5, %v353_v7  ;;  %v359_v12 = vadd.f32 0.5, %v358_v51  ;;  %v366_v26 = vmul.f32 0.5, %v364_v25 }
 0x13a   :  { %v356_v13 = vadd.f32 0.5, %v355_v11  ;;  %v362_v20 = vmul.f32 %v360_v15, %v359_v12  ;;  %v367_v30 = vadd.f32 0.5, %v366_v26 }
 0x13c   :  { %v357_v16 = vmul.f32 0.0, %v356_v13 }
 0x13e   :  { %v2751_v24 = vadd.f32 %v362_v20, %v357_v16 }
 0x140   :  { %2428 = vtanh.f32 %v2751_v24 }
 0x14a   :  { %v2429_v31 = vpop.eup %2428 }
 0x14b   :  { %v369_v33 = vmul.f32 %v2429_v31, %v367_v30 }
 0x14d   :  { %437 = vmatmul.mubr.f32.vlgmr.msra.gmra.mrb[2].mxu0 %v369_v33  ;;  %508 = vmatmul.mubr.f32.vlgmr.msra.gmra.mrb[2].mxu1 %v369_v33 }
 0x14e   :  { %2008 = vmatpush1.bf16.msra.mxu0 %v2607_v10  ;;  %2040 = vmatpush1.bf16.msra.mxu1 %v2610_v14 }
 0x14f   :  { %2010 = vmatprep.subr.bf16.mxu0 %v2614_v18  ;;  %2042 = vmatprep.subr.bf16.mxu1 %v2616_v19 }
 0x150   :  { %629 = vmatprep.mubr.f32.mxu0 %v2536_v0  ;;  %700 = vmatprep.mubr.f32.mxu1 %v2536_v0 }
 0x152   :  { %2012 = vmatpush1.bf16.msra.mxu0 %v2619_v23  ;;  %2044 = vmatpush1.bf16.msra.mxu1 %v2623_v27 }
 0x153   :  { %2014 = vmatprep.subr.bf16.mxu0 %v2625_v28  ;;  %2046 = vmatprep.subr.bf16.mxu1 %v2627_v32 }
 0x156   :  { %2016 = vmatpush1.bf16.msra.mxu0 %v2630_v36  ;;  %2048 = vmatpush1.bf16.msra.mxu1 %v2634_v40 }
 0x157   :  { %2018 = vmatprep.subr.bf16.mxu0 %v2636_v41  ;;  %2050 = vmatprep.subr.bf16.mxu1 %v2639_v45 }
 0x15a   :  { %2020 = vmatpush1.bf16.msra.mxu0 %v2642_v52  ;;  %2052 = vmatpush1.bf16.msra.mxu1 %v2646_v53 }
 0x15b   :  { %2022 = vmatprep.subr.bf16.mxu0 %v2648_v54  ;;  %2054 = vmatprep.subr.bf16.mxu1 %v2651_v58 }
 0x15e   :  { %2024 = vmatpush1.bf16.msra.mxu0 %v2654_v1  ;;  %2056 = vmatpush1.bf16.msra.mxu1 %v2658_v2 }
 0x15f   :  { %2026 = vmatprep.subr.bf16.mxu0 %v2660_v3  ;;  %2058 = vmatprep.subr.bf16.mxu1 %v2663_v8 }
 0x162   :  { %2028 = vmatpush1.bf16.msra.mxu0 %v2666_v17  ;;  %2060 = vmatpush1.bf16.msra.mxu1 %v2670_v21 }
 0x163   :  { %2030 = vmatprep.subr.bf16.mxu0 %v2672_v22  ;;  %2062 = vmatprep.subr.bf16.mxu1 %v2678_v29 }
 0x166   :  { %2032 = vmatpush1.bf16.msra.mxu0 %v2681_v37  ;;  %2064 = vmatpush1.bf16.msra.mxu1 %v2685_v38 }
 0x167   :  { %2034 = vmatprep.subr.bf16.mxu0 %v2687_v39  ;;  %2066 = vmatprep.subr.bf16.mxu1 %v2690_v44 }
 0x16a   :  { %2036 = vmatpush1.bf16.msra.mxu0 %v2693_v48  ;;  %2068 = vmatpush1.bf16.msra.mxu1 %v2697_v49 }
 0x16b   :  { %2070 = vmatprep.subr.bf16.mxu0 %v2603_v5  ;;  %2102 = vmatprep.subr.bf16.mxu1 %v2605_v9 }
 0x220   :  { %v438_v34 = vpop.f32.mrb[2].mxu0  ;;  %v509_v35 = vpop.f32.mrb[2].mxu1 }
 0x221   :  { %v440_v42 = vpop.f32.mrb[3].mxu0  ;;  %v511_v46 = vpop.f32.mrb[3].mxu1 }
 0x222   :  { %v518_v47 = vcombine.low %v438_v34, %v440_v42  ;;  %v519_v50 = vcombine.low %v509_v35, %v511_v46 }
 0x224   :  { %v526_v55 = vrot.slane %v518_v47, %v2746_v43  ;;  %v533_v56 = vrot.slane %v519_v50, %v2746_v43 }
 0x226   :  { %v534_v57 = vcombine.low %v526_v55, %v533_v56  ;;  %v564_v56 = vld [vmem:[#allocation2 + $0x2] ss:$8 sm:$0xf] }
 0x228   :  { %v541_v59 = vrot.slane %v534_v57, %v2746_v43 }
 0x22a   :  { %v543_v61 = vadd.f32 %v541_v59, %v371_v60 }
 0x22c   :  { %2430 = vtanh.f32 %v543_v61 }
 0x236   :  { %v2431_v62 = vpop.eup %2430 }
 0x237   :  { %v546_v63 = vrot.slane %v2431_v62, 1  ;;  %v551_v4 = vmul.f32 0.5, %v2431_v62  ;;  %v553_v11 = vrot.slane %v2431_v62, 3  ;;  %v557_v16 = vrot.slane %v2431_v62, 2 }
 0x239   :  { %v548_v6 = vmul.f32 0.5, %v546_v63  ;;  %v552_v7 = vadd.f32 0.5, %v551_v4  ;;  %v559_v20 = vmul.f32 0.5, %v557_v16 }
 0x23b   :  { %v549_v51 = vadd.f32 0.5, %v548_v6  ;;  %v555_v13 = vmul.f32 %v553_v11, %v552_v7  ;;  %v560_v25 = vadd.f32 0.5, %v559_v20 }
 0x23d   :  { %v550_v12 = vmul.f32 %v549_v51, %v2751_v24 }
 0x23f   :  { %v2792_v15 = vadd.f32 %v555_v13, %v550_v12 }
 0x241   :  { %2432 = vtanh.f32 %v2792_v15 }
 0x24b   :  { %v2433_v26 = vpop.eup %2432 }
 0x24c   :  { %v562_v30 = vmul.f32 %v2433_v26, %v560_v25 }
 0x24e   :  { %630 = vmatmul.mubr.f32.vlgmr.msra.gmra.mrb[4].mxu0 %v562_v30  ;;  %701 = vmatmul.mubr.f32.vlgmr.msra.gmra.mrb[4].mxu1 %v562_v30 }
 0x24f   :  { %2072 = vmatpush1.bf16.msra.mxu0 %v2607_v10  ;;  %2104 = vmatpush1.bf16.msra.mxu1 %v2610_v14 }
 0x250   :  { %2074 = vmatprep.subr.bf16.mxu0 %v2614_v18  ;;  %2106 = vmatprep.subr.bf16.mxu1 %v2616_v19 }
 0x251   :  { %822 = vmatprep.mubr.f32.mxu0 %v2536_v0  ;;  %893 = vmatprep.mubr.f32.mxu1 %v2536_v0 }
 0x253   :  { %2076 = vmatpush1.bf16.msra.mxu0 %v2619_v23  ;;  %2108 = vmatpush1.bf16.msra.mxu1 %v2623_v27 }
 0x254   :  { %2078 = vmatprep.subr.bf16.mxu0 %v2625_v28  ;;  %2110 = vmatprep.subr.bf16.mxu1 %v2627_v32 }
 0x257   :  { %2080 = vmatpush1.bf16.msra.mxu0 %v2630_v36  ;;  %2112 = vmatpush1.bf16.msra.mxu1 %v2634_v40 }
 0x258   :  { %2082 = vmatprep.subr.bf16.mxu0 %v2636_v41  ;;  %2114 = vmatprep.subr.bf16.mxu1 %v2639_v45 }
 0x25b   :  { %2084 = vmatpush1.bf16.msra.mxu0 %v2642_v52  ;;  %2116 = vmatpush1.bf16.msra.mxu1 %v2646_v53 }
 0x25c   :  { %2086 = vmatprep.subr.bf16.mxu0 %v2648_v54  ;;  %2118 = vmatprep.subr.bf16.mxu1 %v2651_v58 }
 0x25f   :  { %2088 = vmatpush1.bf16.msra.mxu0 %v2654_v1  ;;  %2120 = vmatpush1.bf16.msra.mxu1 %v2658_v2 }
 0x260   :  { %2090 = vmatprep.subr.bf16.mxu0 %v2660_v3  ;;  %2122 = vmatprep.subr.bf16.mxu1 %v2663_v8 }
 0x263   :  { %2092 = vmatpush1.bf16.msra.mxu0 %v2666_v17  ;;  %2124 = vmatpush1.bf16.msra.mxu1 %v2670_v21 }
 0x264   :  { %2094 = vmatprep.subr.bf16.mxu0 %v2672_v22  ;;  %2126 = vmatprep.subr.bf16.mxu1 %v2678_v29 }
 0x267   :  { %2096 = vmatpush1.bf16.msra.mxu0 %v2681_v37  ;;  %2128 = vmatpush1.bf16.msra.mxu1 %v2685_v38 }
 0x268   :  { %2098 = vmatprep.subr.bf16.mxu0 %v2687_v39  ;;  %2130 = vmatprep.subr.bf16.mxu1 %v2690_v44 }
 0x26b   :  { %2100 = vmatpush1.bf16.msra.mxu0 %v2693_v48  ;;  %2132 = vmatpush1.bf16.msra.mxu1 %v2697_v49 }
 0x26c   :  { %2134 = vmatprep.subr.bf16.mxu0 %v2603_v5  ;;  %2166 = vmatprep.subr.bf16.mxu1 %v2605_v9 }
 0x321   :  { %v631_v24 = vpop.f32.mrb[4].mxu0  ;;  %v702_v31 = vpop.f32.mrb[4].mxu1 }
 0x322   :  { %v633_v33 = vpop.f32.mrb[5].mxu0  ;;  %v704_v34 = vpop.f32.mrb[5].mxu1 }
 0x323   :  { %v711_v35 = vcombine.low %v631_v24, %v633_v33  ;;  %v712_v42 = vcombine.low %v702_v31, %v704_v34 }
 0x325   :  { %v719_v46 = vrot.slane %v711_v35, %v2746_v43  ;;  %v726_v47 = vrot.slane %v712_v42, %v2746_v43 }
 0x327   :  { %v727_v50 = vcombine.low %v719_v46, %v726_v47  ;;  %v757_v47 = vld [vmem:[#allocation2 + $0x3] ss:$8 sm:$0xf] }
 0x329   :  { %v734_v55 = vrot.slane %v727_v50, %v2746_v43 }
 0x32b   :  { %v736_v57 = vadd.f32 %v734_v55, %v564_v56 }
 0x32d   :  { %2434 = vtanh.f32 %v736_v57 }
 0x337   :  { %v2435_v59 = vpop.eup %2434 }
 0x338   :  { %v739_v60 = vrot.slane %v2435_v59, 1  ;;  %v744_v61 = vmul.f32 0.5, %v2435_v59  ;;  %v746_v6 = vrot.slane %v2435_v59, 3  ;;  %v750_v12 = vrot.slane %v2435_v59, 2 }
 0x33a   :  { %v741_v62 = vmul.f32 0.5, %v739_v60  ;;  %v745_v63 = vadd.f32 0.5, %v744_v61  ;;  %v752_v13 = vmul.f32 0.5, %v750_v12 }
 0x33c   :  { %v742_v4 = vadd.f32 0.5, %v741_v62  ;;  %v748_v51 = vmul.f32 %v746_v6, %v745_v63  ;;  %v753_v16 = vadd.f32 0.5, %v752_v13 }
 0x33e   :  { %v743_v7 = vmul.f32 %v742_v4, %v2792_v15 }
 0x340   :  { %v2833_v11 = vadd.f32 %v748_v51, %v743_v7 }
 0x342   :  { %2436 = vtanh.f32 %v2833_v11 }
 0x34c   :  { %v2437_v20 = vpop.eup %2436 }
 0x34d   :  { %v755_v25 = vmul.f32 %v2437_v20, %v753_v16 }
 0x34f   :  { %823 = vmatmul.mubr.f32.vlgmr.msra.gmra.mrb[6].mxu0 %v755_v25  ;;  %894 = vmatmul.mubr.f32.vlgmr.msra.gmra.mrb[6].mxu1 %v755_v25 }
 0x350   :  { %2136 = vmatpush1.bf16.msra.mxu0 %v2607_v10  ;;  %2168 = vmatpush1.bf16.msra.mxu1 %v2610_v14 }
 0x351   :  { %2138 = vmatprep.subr.bf16.mxu0 %v2614_v18  ;;  %2170 = vmatprep.subr.bf16.mxu1 %v2616_v19 }
 0x352   :  { %1015 = vmatprep.mubr.f32.mxu0 %v2536_v0  ;;  %1086 = vmatprep.mubr.f32.mxu1 %v2536_v0 }
 0x354   :  { %2140 = vmatpush1.bf16.msra.mxu0 %v2619_v23  ;;  %2172 = vmatpush1.bf16.msra.mxu1 %v2623_v27 }
 0x355   :  { %2142 = vmatprep.subr.bf16.mxu0 %v2625_v28  ;;  %2174 = vmatprep.subr.bf16.mxu1 %v2627_v32 }
 0x358   :  { %2144 = vmatpush1.bf16.msra.mxu0 %v2630_v36  ;;  %2176 = vmatpush1.bf16.msra.mxu1 %v2634_v40 }
 0x359   :  { %2146 = vmatprep.subr.bf16.mxu0 %v2636_v41  ;;  %2178 = vmatprep.subr.bf16.mxu1 %v2639_v45 }
 0x35c   :  { %2148 = vmatpush1.bf16.msra.mxu0 %v2642_v52  ;;  %2180 = vmatpush1.bf16.msra.mxu1 %v2646_v53 }
 0x35d   :  { %2150 = vmatprep.subr.bf16.mxu0 %v2648_v54  ;;  %2182 = vmatprep.subr.bf16.mxu1 %v2651_v58 }
 0x360   :  { %2152 = vmatpush1.bf16.msra.mxu0 %v2654_v1  ;;  %2184 = vmatpush1.bf16.msra.mxu1 %v2658_v2 }
 0x361   :  { %2154 = vmatprep.subr.bf16.mxu0 %v2660_v3  ;;  %2186 = vmatprep.subr.bf16.mxu1 %v2663_v8 }
 0x364   :  { %2156 = vmatpush1.bf16.msra.mxu0 %v2666_v17  ;;  %2188 = vmatpush1.bf16.msra.mxu1 %v2670_v21 }
 0x365   :  { %2158 = vmatprep.subr.bf16.mxu0 %v2672_v22  ;;  %2190 = vmatprep.subr.bf16.mxu1 %v2678_v29 }
 0x368   :  { %2160 = vmatpush1.bf16.msra.mxu0 %v2681_v37  ;;  %2192 = vmatpush1.bf16.msra.mxu1 %v2685_v38 }
 0x369   :  { %2162 = vmatprep.subr.bf16.mxu0 %v2687_v39  ;;  %2194 = vmatprep.subr.bf16.mxu1 %v2690_v44 }
 0x36c   :  { %2164 = vmatpush1.bf16.msra.mxu0 %v2693_v48  ;;  %2196 = vmatpush1.bf16.msra.mxu1 %v2697_v49 }
 0x36d   :  { %2198 = vmatprep.subr.bf16.mxu0 %v2603_v5  ;;  %2230 = vmatprep.subr.bf16.mxu1 %v2605_v9 }
 0x422   :  { %v824_v15 = vpop.f32.mrb[6].mxu0  ;;  %v895_v26 = vpop.f32.mrb[6].mxu1 }
 0x423   :  { %v826_v30 = vpop.f32.mrb[7].mxu0  ;;  %v897_v24 = vpop.f32.mrb[7].mxu1 }
 0x424   :  { %v904_v31 = vcombine.low %v824_v15, %v826_v30  ;;  %v905_v33 = vcombine.low %v895_v26, %v897_v24 }
 0x426   :  { %v912_v34 = vrot.slane %v904_v31, %v2746_v43  ;;  %v919_v35 = vrot.slane %v905_v33, %v2746_v43 }
 0x428   :  { %v920_v42 = vcombine.low %v912_v34, %v919_v35  ;;  %v950_v35 = vld [vmem:[#allocation2 + $0x4] ss:$8 sm:$0xf] }
 0x42a   :  { %v927_v46 = vrot.slane %v920_v42, %v2746_v43 }
 0x42c   :  { %v929_v50 = vadd.f32 %v927_v46, %v757_v47 }
 0x42e   :  { %2438 = vtanh.f32 %v929_v50 }
 0x438   :  { %v2439_v55 = vpop.eup %2438 }
 0x439   :  { %v932_v56 = vrot.slane %v2439_v55, 1  ;;  %v937_v57 = vmul.f32 0.5, %v2439_v55  ;;  %v939_v62 = vrot.slane %v2439_v55, 3  ;;  %v943_v7 = vrot.slane %v2439_v55, 2 }
 0x43b   :  { %v934_v59 = vmul.f32 0.5, %v932_v56  ;;  %v938_v60 = vadd.f32 0.5, %v937_v57  ;;  %v945_v51 = vmul.f32 0.5, %v943_v7 }
 0x43d   :  { %v935_v61 = vadd.f32 0.5, %v934_v59  ;;  %v941_v4 = vmul.f32 %v939_v62, %v938_v60  ;;  %v946_v12 = vadd.f32 0.5, %v945_v51 }
 0x43f   :  { %v936_v63 = vmul.f32 %v935_v61, %v2833_v11 }
 0x441   :  { %v2874_v6 = vadd.f32 %v941_v4, %v936_v63 }
 0x443   :  { %2440 = vtanh.f32 %v2874_v6 }
 0x44d   :  { %v2441_v13 = vpop.eup %2440 }
 0x44e   :  { %v948_v16 = vmul.f32 %v2441_v13, %v946_v12 }
 0x450   :  { %1016 = vmatmul.mubr.f32.vlgmr.msra.gmra.mrb[8].mxu0 %v948_v16  ;;  %1087 = vmatmul.mubr.f32.vlgmr.msra.gmra.mrb[8].mxu1 %v948_v16 }
 0x451   :  { %2200 = vmatpush1.bf16.msra.mxu0 %v2607_v10  ;;  %2232 = vmatpush1.bf16.msra.mxu1 %v2610_v14 }
 0x452   :  { %2202 = vmatprep.subr.bf16.mxu0 %v2614_v18  ;;  %2234 = vmatprep.subr.bf16.mxu1 %v2616_v19 }
 0x453   :  { %1208 = vmatprep.mubr.f32.mxu0 %v2536_v0  ;;  %1279 = vmatprep.mubr.f32.mxu1 %v2536_v0 }
 0x455   :  { %2204 = vmatpush1.bf16.msra.mxu0 %v2619_v23  ;;  %2236 = vmatpush1.bf16.msra.mxu1 %v2623_v27 }
 0x456   :  { %2206 = vmatprep.subr.bf16.mxu0 %v2625_v28  ;;  %2238 = vmatprep.subr.bf16.mxu1 %v2627_v32 }
 0x459   :  { %2208 = vmatpush1.bf16.msra.mxu0 %v2630_v36  ;;  %2240 = vmatpush1.bf16.msra.mxu1 %v2634_v40 }
 0x45a   :  { %2210 = vmatprep.subr.bf16.mxu0 %v2636_v41  ;;  %2242 = vmatprep.subr.bf16.mxu1 %v2639_v45 }
 0x45d   :  { %2212 = vmatpush1.bf16.msra.mxu0 %v2642_v52  ;;  %2244 = vmatpush1.bf16.msra.mxu1 %v2646_v53 }
 0x45e   :  { %2214 = vmatprep.subr.bf16.mxu0 %v2648_v54  ;;  %2246 = vmatprep.subr.bf16.mxu1 %v2651_v58 }
 0x461   :  { %2216 = vmatpush1.bf16.msra.mxu0 %v2654_v1  ;;  %2248 = vmatpush1.bf16.msra.mxu1 %v2658_v2 }
 0x462   :  { %2218 = vmatprep.subr.bf16.mxu0 %v2660_v3  ;;  %2250 = vmatprep.subr.bf16.mxu1 %v2663_v8 }
 0x465   :  { %2220 = vmatpush1.bf16.msra.mxu0 %v2666_v17  ;;  %2252 = vmatpush1.bf16.msra.mxu1 %v2670_v21 }
 0x466   :  { %2222 = vmatprep.subr.bf16.mxu0 %v2672_v22  ;;  %2254 = vmatprep.subr.bf16.mxu1 %v2678_v29 }
 0x469   :  { %2224 = vmatpush1.bf16.msra.mxu0 %v2681_v37  ;;  %2256 = vmatpush1.bf16.msra.mxu1 %v2685_v38 }
 0x46a   :  { %2226 = vmatprep.subr.bf16.mxu0 %v2687_v39  ;;  %2258 = vmatprep.subr.bf16.mxu1 %v2690_v44 }
 0x46d   :  { %2228 = vmatpush1.bf16.msra.mxu0 %v2693_v48  ;;  %2260 = vmatpush1.bf16.msra.mxu1 %v2697_v49 }
 0x46e   :  { %2262 = vmatprep.subr.bf16.mxu0 %v2603_v5  ;;  %2294 = vmatprep.subr.bf16.mxu1 %v2605_v9 }
 0x523   :  { %v1017_v11 = vpop.f32.mrb[8].mxu0  ;;  %v1088_v20 = vpop.f32.mrb[8].mxu1 }
 0x524   :  { %v1019_v25 = vpop.f32.mrb[9].mxu0  ;;  %v1090_v15 = vpop.f32.mrb[9].mxu1 }
 0x525   :  { %v1097_v26 = vcombine.low %v1017_v11, %v1019_v25  ;;  %v1098_v30 = vcombine.low %v1088_v20, %v1090_v15 }
 0x527   :  { %v1105_v24 = vrot.slane %v1097_v26, %v2746_v43  ;;  %v1112_v31 = vrot.slane %v1098_v30, %v2746_v43 }
 0x529   :  { %v1113_v33 = vcombine.low %v1105_v24, %v1112_v31  ;;  %v1143_v31 = vld [vmem:[#allocation2 + $0x5] ss:$8 sm:$0xf] }
 0x52b   :  { %v1120_v34 = vrot.slane %v1113_v33, %v2746_v43 }
 0x52d   :  { %v1122_v42 = vadd.f32 %v1120_v34, %v950_v35 }
 0x52f   :  { %2442 = vtanh.f32 %v1122_v42 }
 0x539   :  { %v2443_v46 = vpop.eup %2442 }
 0x53a   :  { %v1125_v47 = vrot.slane %v2443_v46, 1  ;;  %v1130_v50 = vmul.f32 0.5, %v2443_v46  ;;  %v1132_v59 = vrot.slane %v2443_v46, 3  ;;  %v1136_v63 = vrot.slane %v2443_v46, 2 }
 0x53c   :  { %v1127_v55 = vmul.f32 0.5, %v1125_v47  ;;  %v1131_v56 = vadd.f32 0.5, %v1130_v50  ;;  %v1138_v4 = vmul.f32 0.5, %v1136_v63 }
 0x53e   :  { %v1128_v57 = vadd.f32 0.5, %v1127_v55  ;;  %v1134_v61 = vmul.f32 %v1132_v59, %v1131_v56  ;;  %v1139_v7 = vadd.f32 0.5, %v1138_v4 }
 0x540   :  { %v1129_v60 = vmul.f32 %v1128_v57, %v2874_v6 }
 0x542   :  { %v2915_v62 = vadd.f32 %v1134_v61, %v1129_v60 }
 0x544   :  { %2444 = vtanh.f32 %v2915_v62 }
 0x54e   :  { %v2445_v51 = vpop.eup %2444 }
 0x54f   :  { %v1141_v12 = vmul.f32 %v2445_v51, %v1139_v7  ;;  %v1724_v7 = vld [vmem:[#allocation6 + $0x18] sm:$0xff] }
 0x551   :  { %1209 = vmatmul.mubr.f32.vlgmr.msra.gmra.mrb[10].mxu0 %v1141_v12  ;;  %1280 = vmatmul.mubr.f32.vlgmr.msra.gmra.mrb[10].mxu1 %v1141_v12  ;;  %v1725_v12 = vld [vmem:[#allocation6 + $0x20] sm:$0xff] }
 0x552   :  { %2264 = vmatpush1.bf16.msra.mxu0 %v2607_v10  ;;  %2296 = vmatpush1.bf16.msra.mxu1 %v2610_v14 }
 0x553   :  { %2266 = vmatprep.subr.bf16.mxu0 %v2614_v18  ;;  %2298 = vmatprep.subr.bf16.mxu1 %v2616_v19 }
 0x554   :  { %1401 = vmatprep.mubr.f32.mxu0 %v2536_v0  ;;  %1472 = vmatprep.mubr.f32.mxu1 %v2536_v0 }
 0x556   :  { %2268 = vmatpush1.bf16.msra.mxu0 %v2619_v23  ;;  %2300 = vmatpush1.bf16.msra.mxu1 %v2623_v27 }
 0x557   :  { %2270 = vmatprep.subr.bf16.mxu0 %v2625_v28  ;;  %2302 = vmatprep.subr.bf16.mxu1 %v2627_v32 }
 0x55a   :  { %2272 = vmatpush1.bf16.msra.mxu0 %v2630_v36  ;;  %2304 = vmatpush1.bf16.msra.mxu1 %v2634_v40 }
 0x55b   :  { %2274 = vmatprep.subr.bf16.mxu0 %v2636_v41  ;;  %2306 = vmatprep.subr.bf16.mxu1 %v2639_v45 }
 0x55e   :  { %2276 = vmatpush1.bf16.msra.mxu0 %v2642_v52  ;;  %2308 = vmatpush1.bf16.msra.mxu1 %v2646_v53 }
 0x55f   :  { %2278 = vmatprep.subr.bf16.mxu0 %v2648_v54  ;;  %2310 = vmatprep.subr.bf16.mxu1 %v2651_v58 }
 0x562   :  { %2280 = vmatpush1.bf16.msra.mxu0 %v2654_v1  ;;  %2312 = vmatpush1.bf16.msra.mxu1 %v2658_v2 }
 0x563   :  { %2282 = vmatprep.subr.bf16.mxu0 %v2660_v3  ;;  %2314 = vmatprep.subr.bf16.mxu1 %v2663_v8 }
 0x566   :  { %2284 = vmatpush1.bf16.msra.mxu0 %v2666_v17  ;;  %2316 = vmatpush1.bf16.msra.mxu1 %v2670_v21 }
 0x567   :  { %2286 = vmatprep.subr.bf16.mxu0 %v2672_v22  ;;  %2318 = vmatprep.subr.bf16.mxu1 %v2678_v29 }
 0x56a   :  { %2288 = vmatpush1.bf16.msra.mxu0 %v2681_v37  ;;  %2320 = vmatpush1.bf16.msra.mxu1 %v2685_v38 }
 0x56b   :  { %2290 = vmatprep.subr.bf16.mxu0 %v2687_v39  ;;  %2322 = vmatprep.subr.bf16.mxu1 %v2690_v44 }
 0x56e   :  { %2292 = vmatpush1.bf16.msra.mxu0 %v2693_v48  ;;  %2324 = vmatpush1.bf16.msra.mxu1 %v2697_v49 }
 0x56f   :  { %2326 = vmatprep.subr.bf16.mxu0 %v2603_v5  ;;  %2358 = vmatprep.subr.bf16.mxu1 %v2605_v9 }
 0x624   :  { %v1210_v6 = vpop.f32.mrb[10].mxu0  ;;  %v1281_v13 = vpop.f32.mrb[10].mxu1 }
 0x625   :  { %v1212_v16 = vpop.f32.mrb[11].mxu0  ;;  %v1283_v11 = vpop.f32.mrb[11].mxu1 }
 0x626   :  { %v1290_v20 = vcombine.low %v1210_v6, %v1212_v16  ;;  %v1291_v25 = vcombine.low %v1281_v13, %v1283_v11  ;;  %v1726_v6 = vld [vmem:[#allocation6 + $0x28] sm:$0xff]  ;;  %v1727_v16 = vld [vmem:[#allocation6 + $0x30] sm:$0xff]  ;;  %v1728_v11 = vld [vmem:[#allocation6 + $0x38] sm:$0xff] }
 0x627   :  { %v2396_v13 = vpack.c.bf16 %v1726_v6, %v1725_v12 }
 0x628   :  { %v1298_v15 = vrot.slane %v1290_v20, %v2746_v43  ;;  %v1305_v26 = vrot.slane %v1291_v25, %v2746_v43  ;;  %v2399_v20 = vpack.c.bf16 %v1728_v11, %v1727_v16  ;;  %v1729_v25 = vld [vmem:[#allocation6 + $0x40] sm:$0xff] }
 0x62a   :  { %v1306_v30 = vcombine.low %v1298_v15, %v1305_v26  ;;  %v1730_v15 = vld [vmem:[#allocation6 + $0x48] sm:$0xff] }
 0x62b   :  { %v2402_v26 = vpack.c.bf16 %v1730_v15, %v1729_v25 }
 0x62c   :  { %v1313_v24 = vrot.slane %v1306_v30, %v2746_v43  ;;  %v1731_v30 = vld [vmem:[#allocation6 + $0x50] sm:$0xff] }
 0x62e   :  { %v1315_v33 = vadd.f32 %v1313_v24, %v1143_v31  ;;  %v1733_v31 = vld [vmem:[#allocation6 + $0x60] sm:$0xff] }
 0x630   :  { %2446 = vtanh.f32 %v1315_v33  ;;  %v1734_v33 = vld [vmem:[#allocation6 + $0x68] sm:$0xff] }
 0x63a   :  { %v2447_v34 = vpop.eup %2446 }
 0x63b   :  { %v1318_v5 = vrot.slane %v2447_v34, 1  ;;  %v1323_v35 = vmul.f32 0.5, %v2447_v34  ;;  %v1325_v47 = vrot.slane %v2447_v34, 3  ;;  %v1329_v57 = vrot.slane %v2447_v34, 2 }
 0x63c   :  { %v2408_v34 = vpack.c.bf16 %v1734_v33, %v1733_v31 }
 0x63d   :  { %v1320_v9 = vmul.f32 0.5, %v1318_v5  ;;  %v1324_v42 = vadd.f32 0.5, %v1323_v35  ;;  %v1331_v59 = vmul.f32 0.5, %v1329_v57  ;;  %v1735_v5 = vld [vmem:[#allocation6 + $0x70] sm:$0xff]  ;;  %v1736_v35 = vld [vmem:[#allocation6 + $0x78] sm:$0xff] }
 0x63f   :  { %v1321_v46 = vadd.f32 0.5, %v1320_v9  ;;  %v1327_v55 = vmul.f32 %v1325_v47, %v1324_v42  ;;  %v1332_v60 = vadd.f32 0.5, %v1331_v59  ;;  %v2411_v9 = vpack.c.bf16 %v1736_v35, %v1735_v5 }
 0x641   :  { %v1322_v50 = vmul.f32 %v1321_v46, %v2915_v62  ;;  %v2539_v62 = vmov 0.0|0.0  }
 0x643   :  { %v1328_v56 = vadd.f32 %v1327_v55, %v1322_v50 }
 0x645   :  { %2448 = vtanh.f32 %v1328_v56 }
 0x64f   :  { %v2449_v61 = vpop.eup %2448 }
 0x650   :  { %v1334_v63 = vmul.f32 %v2449_v61, %v1332_v60 }
 0x652   :  { %1402 = vmatmul.mubr.f32.vlgmr.msra.gmra.mrb[12].mxu0 %v1334_v63  ;;  %1473 = vmatmul.mubr.f32.vlgmr.msra.gmra.mrb[12].mxu1 %v1334_v63  ;;  %v1529_v63 = vld [vmem:[#allocation2 + $0x7] ss:$8 sm:$0xf] }
 0x653   :  { %2328 = vmatpush1.bf16.msra.mxu0 %v2607_v10  ;;  %2360 = vmatpush1.bf16.msra.mxu1 %v2610_v14 }
 0x654   :  { %2330 = vmatprep.subr.bf16.mxu0 %v2614_v18  ;;  %2362 = vmatprep.subr.bf16.mxu1 %v2616_v19 }
 0x655   :  { %1594 = vmatprep.mubr.f32.mxu0 %v2536_v0  ;;  %1665 = vmatprep.mubr.f32.mxu1 %v2536_v0 }
 0x657   :  { %2332 = vmatpush1.bf16.msra.mxu0 %v2619_v23  ;;  %2364 = vmatpush1.bf16.msra.mxu1 %v2623_v27 }
 0x658   :  { %2334 = vmatprep.subr.bf16.mxu0 %v2625_v28  ;;  %2366 = vmatprep.subr.bf16.mxu1 %v2627_v32 }
 0x65b   :  { %2336 = vmatpush1.bf16.msra.mxu0 %v2630_v36  ;;  %2368 = vmatpush1.bf16.msra.mxu1 %v2634_v40 }
 0x65c   :  { %2338 = vmatprep.subr.bf16.mxu0 %v2636_v41  ;;  %2370 = vmatprep.subr.bf16.mxu1 %v2639_v45  ;;  %v1336_v41 = vld [vmem:[#allocation2 + $0x6] ss:$8 sm:$0xf] }
 0x65f   :  { %2340 = vmatpush1.bf16.msra.mxu0 %v2642_v52  ;;  %2372 = vmatpush1.bf16.msra.mxu1 %v2646_v53 }
 0x660   :  { %2342 = vmatprep.subr.bf16.mxu0 %v2648_v54  ;;  %2374 = vmatprep.subr.bf16.mxu1 %v2651_v58 }
 0x663   :  { %2344 = vmatpush1.bf16.msra.mxu0 %v2654_v1  ;;  %2376 = vmatpush1.bf16.msra.mxu1 %v2658_v2 }
 0x664   :  { %2346 = vmatprep.subr.bf16.mxu0 %v2660_v3  ;;  %2378 = vmatprep.subr.bf16.mxu1 %v2663_v8 }
 0x667   :  { %2348 = vmatpush1.bf16.msra.mxu0 %v2666_v17  ;;  %2380 = vmatpush1.bf16.msra.mxu1 %v2670_v21 }
 0x668   :  { %2350 = vmatprep.subr.bf16.mxu0 %v2672_v22  ;;  %2382 = vmatprep.subr.bf16.mxu1 %v2678_v29 }
 0x66b   :  { %2352 = vmatpush1.bf16.msra.mxu0 %v2681_v37  ;;  %2384 = vmatpush1.bf16.msra.mxu1 %v2685_v38 }
 0x66c   :  { %2354 = vmatprep.subr.bf16.mxu0 %v2687_v39  ;;  %2386 = vmatprep.subr.bf16.mxu1 %v2690_v44  ;;  %v1721_v44 = vld [vmem:[#allocation6] sm:$0xff] }
 0x66f   :  { %2356 = vmatpush1.bf16.msra.mxu0 %v2693_v48  ;;  %2388 = vmatpush1.bf16.msra.mxu1 %v2697_v49  ;;  %v1722_v48 = vld [vmem:[#allocation6 + $0x8] sm:$0xff]  ;;  %v1723_v49 = vld [vmem:[#allocation6 + $0x10] sm:$0xff] }
 0x670   :  { %2389 = vmatprep.subr.bf16.mxu0 %v2539_v62  ;;  %v2390_v4 = vpack.c.bf16 %v1722_v48, %v1721_v44  ;;  %v2393_v51 = vpack.c.bf16 %v1724_v7, %v1723_v49 }
 0x725   :  { %v1403_v10 = vpop.f32.mrb[12].mxu0  ;;  %v1474_v14 = vpop.f32.mrb[12].mxu1 }
 0x726   :  { %v1405_v18 = vpop.f32.mrb[13].mxu0  ;;  %v1476_v19 = vpop.f32.mrb[13].mxu1 }
 0x727   :  { %v1483_v23 = vcombine.low %v1403_v10, %v1405_v18  ;;  %v1484_v27 = vcombine.low %v1474_v14, %v1476_v19 }
 0x729   :  { %v1491_v28 = vrot.slane %v1483_v23, %v2746_v43  ;;  %v1498_v32 = vrot.slane %v1484_v27, %v2746_v43 }
 0x72b   :  { %v1499_v36 = vcombine.low %v1491_v28, %v1498_v32 }
 0x72d   :  { %v1506_v40 = vrot.slane %v1499_v36, %v2746_v43 }
 0x72f   :  { %v1508_v45 = vadd.f32 %v1506_v40, %v1336_v41 }
 0x731   :  { %2450 = vtanh.f32 %v1508_v45 }
 0x73b   :  { %v2451_v52 = vpop.eup %2450 }
 0x73c   :  { %v1511_v53 = vrot.slane %v2451_v52, 1  ;;  %v1516_v54 = vmul.f32 0.5, %v2451_v52  ;;  %v1518_v3 = vrot.slane %v2451_v52, 3  ;;  %v1522_v22 = vrot.slane %v2451_v52, 2 }
 0x73e   :  { %v1513_v58 = vmul.f32 0.5, %v1511_v53  ;;  %v1517_v1 = vadd.f32 0.5, %v1516_v54  ;;  %v1524_v29 = vmul.f32 0.5, %v1522_v22 }
 0x740   :  { %v1514_v2 = vadd.f32 0.5, %v1513_v58  ;;  %v1520_v17 = vmul.f32 %v1518_v3, %v1517_v1  ;;  %v1525_v37 = vadd.f32 0.5, %v1524_v29  ;;  %v1737_v58 = vld [vmem:[%s3019_s5] sm:$0x1] }
 0x742   :  { %v1515_v8 = vmul.f32 %v1514_v2, %v1328_v56 }
 0x744   :  { %v2991_v21 = vadd.f32 %v1520_v17, %v1515_v8 }
 0x746   :  { %2452 = vtanh.f32 %v2991_v21 }
 0x750   :  { %v2453_v38 = vpop.eup %2452 }
 0x751   :  { %v1527_v39 = vmul.f32 %v2453_v38, %v1525_v37 }
 0x753   :  { %1595 = vmatmul.mubr.f32.vlgmr.msra.gmra.mrb[14].mxu0 %v1527_v39  ;;  %1666 = vmatmul.mubr.f32.vlgmr.msra.gmra.mrb[14].mxu1 %v1527_v39 }
 0x754   :  { %1874 = vmatprep.mubr.msk.f32.mxu0 %vm2540_vm0, %v2536_v0  ;;  %2391 = vmatpush3.bf16.msra.mxu0 %v2390_v4  ;;  %v1732_v0 = vld [vmem:[#allocation6 + $0x58] sm:$0xff] }
 0x755   :  { %2392 = vmatprep.subr.bf16.mxu0 %v2539_v62  ;;  %v2405_v24 = vpack.c.bf16 %v1732_v0, %v1731_v30 }
 0x758   :  { %2394 = vmatpush3.bf16.msra.mxu0 %v2393_v51 }
 0x759   :  { %2395 = vmatprep.subr.bf16.mxu0 %v2539_v62 }
 0x75c   :  { %2397 = vmatpush3.bf16.msra.mxu0 %v2396_v13 }
 0x75d   :  { %2398 = vmatprep.subr.bf16.mxu0 %v2539_v62 }
 0x760   :  { %2400 = vmatpush3.bf16.msra.mxu0 %v2399_v20 }
 0x761   :  { %2401 = vmatprep.subr.bf16.mxu0 %v2539_v62 }
 0x764   :  { %2403 = vmatpush3.bf16.msra.mxu0 %v2402_v26 }
 0x765   :  { %2404 = vmatprep.subr.bf16.mxu0 %v2539_v62 }
 0x768   :  { %2406 = vmatpush3.bf16.msra.mxu0 %v2405_v24 }
 0x769   :  { %2407 = vmatprep.subr.bf16.mxu0 %v2539_v62 }
 0x76c   :  { %2409 = vmatpush3.bf16.msra.mxu0 %v2408_v34 }
 0x76d   :  { %2410 = vmatprep.subr.bf16.mxu0 %v2539_v62 }
 0x770   :  { %2412 = vmatpush3.bf16.msra.mxu0 %v2411_v9 }
 0x826   :  { %v1596_v42 = vpop.f32.mrb[14].mxu0  ;;  %v1667_v46 = vpop.f32.mrb[14].mxu1 }
 0x827   :  { %v1598_v47 = vpop.f32.mrb[15].mxu0  ;;  %v1669_v50 = vpop.f32.mrb[15].mxu1 }
 0x828   :  { %v1676_v55 = vcombine.low %v1596_v42, %v1598_v47  ;;  %v1677_v56 = vcombine.low %v1667_v46, %v1669_v50 }
 0x82a   :  { %v1684_v57 = vrot.slane %v1676_v55, %v2746_v43  ;;  %v1691_v59 = vrot.slane %v1677_v56, %v2746_v43 }
 0x82c   :  { %v1692_v60 = vcombine.low %v1684_v57, %v1691_v59 }
 0x82e   :  { %v1699_v61 = vrot.slane %v1692_v60, %v2746_v43 }
 0x830   :  { %v1701_v10 = vadd.f32 %v1699_v61, %v1529_v63 }
 0x832   :  { %2454 = vtanh.f32 %v1701_v10 }
 0x83c   :  { %v2455_v14 = vpop.eup %2454 }
 0x83d   :  { %v1704_v18 = vrot.slane %v2455_v14, 1  ;;  %v1709_v19 = vmul.f32 0.5, %v2455_v14  ;;  %v1711_v32 = vrot.slane %v2455_v14, 3  ;;  %v1715_v45 = vrot.slane %v2455_v14, 2 }
 0x83f   :  { %v1706_v23 = vmul.f32 0.5, %v1704_v18  ;;  %v1710_v27 = vadd.f32 0.5, %v1709_v19  ;;  %v1717_v52 = vmul.f32 0.5, %v1715_v45 }
 0x841   :  { %v1707_v28 = vadd.f32 0.5, %v1706_v23  ;;  %v1713_v40 = vmul.f32 %v1711_v32, %v1710_v27  ;;  %v1718_v53 = vadd.f32 0.5, %v1717_v52 }
 0x843   :  { %v1708_v36 = vmul.f32 %v1707_v28, %v2991_v21 }
 0x845   :  { %v1714_v41 = vadd.f32 %v1713_v40, %v1708_v36 }
 0x847   :  { %2456 = vtanh.f32 %v1714_v41 }
 0x851   :  { %v2457_v54 = vpop.eup %2456 }
 0x852   :  { %v1720_v43 = vmul.f32 %v2457_v54, %v1718_v53 }
 0x854   :  { %1875 = vmatmul.mubr.f32.vlgmr.msra.gmra.mrb[16].mxu0 %v1720_v43 }
 0x927   :  { %v1804_v1 = vpop.f32.mrb[16].mxu0 }
 0x928   :  { %v1805_v2 = vadd.f32 %v1804_v1, %v1737_v58  ;;  %v1876_v3 = vpop.f32.mrb[17].mxu0 }
 0x92a   :  { %1808 = vst [vmem:[#allocation8] sm:$0x1] %v1805_v2 }
 0x92b   :  { %2513 = shalt.err (!%p2510_p6)
}
 0x92c   :  { %s2514_s10 = scalar_lea.hbm %s3020_s6, 16 }
 0x92d   :  { %p2515_p7 = scmp.ne.s32.totalorder %s3020_s6, %s2514_s10  ;;  %p2518_p8 = scmp.lt.u32.totalorder %s2514_s10, %s3020_s6 }
 0x92f   :  { %p2520_p9 = pnand %p2518_p8, %p2515_p7 }
 0x931   :  { %2523 = shalt.err (!%p2520_p9)
}
 0x932   :  { %1818 = dma.vmem_to_hbm [thread:$0]  %s1816_s29, 16, %s3020_s6, [#allocation5]  }
 0x933   :  { %2528 = dma.done.wait [#allocation5], 16  }
 0x934   :  { %2529 = vsyncadd [#allocation5], 4294967280 }
 0x935   :  { %1822 = vsyncpa [#allocation4], 1 }
 0x936   :  { %1823 = vsyncpa [#allocation7], 1 }
 0x937   :  { %1824 = vsyncpa [#allocation5], 1 }

</bundles_post_ra>
